<compile_context>
chip_gen: v6e
topology: v6e:2x2x1
jax: 0.10.0
libtpu: 0.0.40
codegen_flags: <defaults>
</compile_context>

<pallas_src>
import math

import jax
import jax.numpy as jnp
import numpy as np
from jax.experimental import pallas as pl
from jax.experimental.pallas import tpu as pltpu


# --------------------------------------------------------------------------- #
# Kernel
# --------------------------------------------------------------------------- #
def _make_ppe_kernel(kernel_size, r1, s1, s2, chid):
    """Build the fused conv1->GN->ReLU->conv2->GN->sigmoid kernel.

    Static closure params:
      kernel_size: conv kernel size K (3)
      r1:          spatial side after conv1 (VALID)
      s1, s2:      spatial sizes (r1^2, r2^2) after conv1 / conv2
      chid:        hidden channel count (conv1 output channels)
    """
    K = kernel_size
    kk = K * K
    eps = 1e-5
    inv_s1 = 1.0 / s1
    inv_s2 = 1.0 / s2

    def dotf(a, b):
        return jnp.dot(a, b, preferred_element_type=jnp.float32)

    def group_norm(a, rm, rb, inv_s, gw, gb):
        # GroupNorm with groups == channels: per-(channel, image) statistics
        # over spatial positions.  rm:(M,bs) 0/1 sums per image, rb:(bs,M)
        # broadcasts the per-image result back to every position.  Two-pass
        # (centered) variance for numerical robustness.
        mean = dotf(a, rm) * inv_s                 # (C, bs)
        c = a - dotf(mean, rb)                     # centered, (C, M)
        var = dotf(c * c, rm) * inv_s              # (C, bs)
        rstd = gw * jax.lax.rsqrt(var + eps)       # GN weight folded, (C, bs)
        return c * dotf(rstd, rb) + gb

    def kernel(cols1_ref, w1_ref, p1_ref, w2_ref, p2_ref,
               r1m_ref, r1b_ref, r2m_ref, r2b_ref, base_ref,
               o_ref, cols2_ref):
        """One grid step (one block of images).

        cols1_ref: (1, K*K*Cin, M1) im2col columns of this step's images
        w1_ref:    (Chid, K*K*Cin)  conv1 weight, columns ordered (dy, dx, ci)
        p1_ref:    (Chid, 3)        [conv1 bias | gn1 weight | gn1 bias]
        w2_ref:    (Cout, K*K*Chid) conv2 weight, columns ordered (dy, dx, ci)
        p2_ref:    (Cout, 3)        [conv2 bias | gn2 weight | gn2 bias]
        r1m_ref:   (M1, bs)  0/1 per-image reduce matrix   (GroupNorm 1)
        r1b_ref:   (bs, M1)  0/1 per-image broadcast matrix
        r2m_ref:   (M2, bs)  0/1 per-image reduce matrix   (GroupNorm 2)
        r2b_ref:   (bs, M2)  0/1 per-image broadcast matrix
        base_ref:  (1, M2)   int32: conv1-output lane index of tap (0,0) for
                             each conv2 output lane (within-step layout)
        o_ref:     (Cout, M2) output block (lane-dense)
        cols2_ref: (K*K*Chid, M2) VMEM scratch: conv2 im2col columns
        """
        m1 = r1m_ref.shape[0]
        m2 = r2m_ref.shape[0]
        p1 = p1_ref[...]
        p2 = p2_ref[...]

        # ---- conv1: one im2col MXU matmul + bias, then GroupNorm + ReLU ----
        acc1 = dotf(w1_ref[...], cols1_ref[0]) + p1[:, 0:1]      # (Chid, M1)
        y1 = jnp.maximum(
            group_norm(acc1, r1m_ref[...], r1b_ref[...], inv_s1,
                       p1[:, 1:2], p1[:, 2:3]), 0.0)

        # ---- conv2 gather: the per-tap one-hot selection matrices are built
        # in registers from a 2-D iota + the prefetched base index (no HBM
        # constants), the gather rides the MXU, and the nine windows are
        # stacked into a (K*K*Chid, M2) scratch so the channel/tap contraction
        # against w2 is ONE matmul. ----
        row = jax.lax.broadcasted_iota(jnp.int32, (m1, m2), 0)
        diff = row - base_ref[...]                                 # (M1, M2)
        for p in range(kk):
            dy, dx = p // K, p % K
            off = dy * r1 + dx
            sel = jnp.where(diff == off, 1.0, 0.0)                 # (M1, M2)
            cols2_ref[p * chid:(p + 1) * chid, :] = dotf(y1, sel)  # (Chid, M2)
        acc2 = dotf(w2_ref[...], cols2_ref[...]) + p2[:, 0:1]      # (Cout, M2)

        # ---- GroupNorm (peripheral init) + sigmoid; lane-dense full store ---
        y2 = jax.nn.sigmoid(
            group_norm(acc2, r2m_ref[...], r2b_ref[...], inv_s2,
                       p2[:, 1:2], p2[:, 2:3]))
        o_ref[...] = y2.astype(o_ref.dtype)

    return kernel


# --------------------------------------------------------------------------- #
# Wrapper-side constants & parameter packing
# --------------------------------------------------------------------------- #
def _gn_reduce_matrices(n_img, s):
    """Skinny 0/1 reduce (n_img*s, n_img) and broadcast (n_img, n_img*s)."""
    r = np.kron(np.eye(n_img, dtype=np.float32), np.ones((s, 1), np.float32))
    return jnp.asarray(r), jnp.asarray(np.ascontiguousarray(r.T))


def _conv2_base_index(n_img, r1, r2):
    """base[j] = conv1-output lane index of tap (0,0) for conv2 lane j."""
    s1, s2 = r1 * r1, r2 * r2
    base = np.zeros((1, n_img * s2), np.int32)
    for b in range(n_img):
        for y in range(r2):
            for x in range(r2):
                base[0, b * s2 + y * r2 + x] = b * s1 + y * r1 + x
    return jnp.asarray(base)


def pack_params(w1_hwio, b1, w2_hwio, b2, gn1w, gn1b, gn2w, gn2b):
    """Pack conv/GN parameters into the kernel's matmul-friendly layout."""
    K = w1_hwio.shape[0]
    cin, chid = w1_hwio.shape[2], w1_hwio.shape[3]
    cout = w2_hwio.shape[3]
    # (Cout_ch, K*K*Cin_ch) with columns flattened in (dy, dx, ci) order.
    w1 = jnp.transpose(w1_hwio, (3, 0, 1, 2)).reshape(chid, K * K * cin)
    w2 = jnp.transpose(w2_hwio, (3, 0, 1, 2)).reshape(cout, K * K * chid)
    p1 = jnp.stack([b1, gn1w, gn1b], axis=1)       # (Chid, 3)
    p2 = jnp.stack([b2, gn2w, gn2b], axis=1)       # (Cout, 3)
    return dict(w1=w1, p1=p1, w2=w2, p2=p2)


def module_init_raw(num_heads, norm_init, kernel_size=3, dtype=jnp.float32):
    """Raw (HWIO) parameters exactly matching the PyTorch module's __init__."""
    cin = chid = num_heads * 4
    cout = num_heads
    K = kernel_size
    return dict(
        w1_hwio=jnp.full((K, K, cin, chid), 0.02, dtype),
        b1=jnp.zeros((chid,), dtype),
        w2_hwio=jnp.full((K, K, chid, cout), 0.02, dtype),
        b2=jnp.zeros((cout,), dtype),
        gn1w=jnp.ones((chid,), dtype),                  # GroupNorm defaults
        gn1b=jnp.zeros((chid,), dtype),
        gn2w=jnp.full((cout,), norm_init[1], dtype),    # _peripheral_init
        gn2b=jnp.full((cout,), norm_init[0], dtype),
    )


# --------------------------------------------------------------------------- #
# Pallas-backed forward
# --------------------------------------------------------------------------- #
def peripheral_position_encoding(x, params, num_heads, kernel_size=3):
    """x: (side^2, side^2, 4*num_heads) -> (1, num_heads, (side-4)^2, (side-4)^2)."""
    del num_heads                              # channel counts come from params
    n_token = x.shape[1]
    side = int(math.sqrt(n_token))
    d = x.shape[2]
    K = kernel_size
    rp = K // 2 * 2                            # remove_pad
    si = side - 2 * rp                         # cropped (i, j) grid
    B = si * si                                # conv batch (number of images)
    r1 = side - K + 1
    r2 = r1 - K + 1
    s1, s2 = r1 * r1, r2 * r2

    chid = params["w1"].shape[0]
    cout = params["w2"].shape[0]

    # Split the image batch over 2 parallel grid steps when possible so the
    # two v7x TensorCores each take half (harmless on single-TC v5e/v6e).
    steps = 2 if B % 2 == 0 else 1
    bs = B // steps
    m1, m2 = bs * s1, bs * s2

    # rearrange '(i j) (k l) d -> d (i j) k l' + crop of the (i, j) grid.
    x5 = x.reshape(side, side, side, side, d).transpose(4, 0, 1, 2, 3)
    x5 = x5[:, rp:side - rp, rp:side - rp, :, :]
    x_cf = x5.reshape(d, B, side, side)        # (Cin, B, H, W), channel first

    # im2col for conv1, done once in XLA: rows ordered (dy, dx, ci), columns
    # (image-major, spatial-minor), pre-split per grid step -> the kernel block
    # is a full lane-dense (K*K*Cin, M1) slab and needs no in-kernel reshapes.
    patches = jnp.stack([x_cf[:, :, dy:dy + r1, dx:dx + r1]
                         for dy in range(K) for dx in range(K)], axis=0)
    cols1 = patches.reshape(K * K * d, B, s1)
    cols1 = cols1.reshape(K * K * d, steps, bs, s1).transpose(1, 0, 2, 3)
    cols1 = cols1.reshape(steps, K * K * d, m1)

    # Tiny constant helpers (~30 KiB total): skinny GroupNorm reduce/broadcast
    # matrices and the conv2 tap-(0,0) base index per output lane.
    r1m, r1b = _gn_reduce_matrices(bs, s1)
    r2m, r2b = _gn_reduce_matrices(bs, s2)
    base_idx = _conv2_base_index(bs, r1, r2)

    kernel = _make_ppe_kernel(K, r1, s1, s2, chid)

    out = pl.pallas_call(
        kernel,
        out_shape=jax.ShapeDtypeStruct((cout, B * s2), jnp.float32),
        grid_spec=pltpu.PrefetchScalarGridSpec(
            num_scalar_prefetch=0,
            grid=(steps,),
            in_specs=[
                pl.BlockSpec((1, K * K * d, m1), lambda i: (i, 0, 0)),
                pl.BlockSpec((chid, K * K * d), lambda i: (0, 0)),
                pl.BlockSpec((chid, 3), lambda i: (0, 0)),
                pl.BlockSpec((cout, K * K * chid), lambda i: (0, 0)),
                pl.BlockSpec((cout, 3), lambda i: (0, 0)),
                pl.BlockSpec((m1, bs), lambda i: (0, 0)),
                pl.BlockSpec((bs, m1), lambda i: (0, 0)),
                pl.BlockSpec((m2, bs), lambda i: (0, 0)),
                pl.BlockSpec((bs, m2), lambda i: (0, 0)),
                pl.BlockSpec((1, m2), lambda i: (0, 0)),
            ],
            out_specs=pl.BlockSpec((cout, m2), lambda i: (0, i)),
            scratch_shapes=[pltpu.VMEM((K * K * chid, m2), jnp.float32)],
        ),
        compiler_params=pltpu.CompilerParams(
            dimension_semantics=("parallel",)),
    )(cols1, params["w1"], params["p1"], params["w2"], params["p2"],
      r1m, r1b, r2m, r2b, base_idx)

    # '(i j) h k l -> () h (i j) (k l)': channels already lead and
    # (image, spatial) is already flattened lane-major -> plain reshape.
    return out.reshape(cout, B, s2)[None]


def mpa_forward(x, rpe, mpa_params, ppe_params, num_heads):
    """MPA.forward: qkv/attention/proj in plain JAX; the peripheral position
    weight map comes from the Pallas kernel (proj_drop omitted / eval mode)."""
    # TODO(synk): proj_drop (Dropout) is omitted — eval-mode forward only.
    b, n, dim = x.shape
    hd = dim // num_heads
    qkv = x @ mpa_params["w_qkv"].T                        # to_qkv (no bias)
    q, k, v = jnp.split(qkv, 3, axis=-1)

    def to_heads(t):
        return t.reshape(b, n, num_heads, hd).transpose(0, 2, 1, 3)

    q, k, v = to_heads(q), to_heads(k), to_heads(v)
    dots = jnp.einsum("bhnd,bhmd->bhnm", q, k) * (hd ** -0.5)
    weight = peripheral_position_encoding(rpe, ppe_params, num_heads)
    dots = jnp.exp(dots - jnp.max(dots, axis=-1, keepdims=True))
    attn = weight * dots
    attn = attn / jnp.maximum(jnp.sum(jnp.abs(attn), axis=-1, keepdims=True),
                              1e-12)                       # F.normalize(p=1)
    out = jnp.einsum("bhnm,bhmd->bhnd", attn, v)
    out = out.transpose(0, 2, 1, 3).reshape(b, n, dim)
    return out @ mpa_params["w_proj"].T + mpa_params["b_proj"]


# --------------------------------------------------------------------------- #
# Pure-JAX reference (lax conv), mirrors the PyTorch forward
# --------------------------------------------------------------------------- #
def reference_forward(x, w1_hwio, b1, w2_hwio, b2, gn1w, gn1b, gn2w, gn2b,
                      num_heads, kernel_size=3):
    side = int(math.sqrt(x.shape[1]))
    d = x.shape[2]
    K = kernel_size
    rp = K // 2 * 2
    x5 = x.reshape(side, side, side, side, d).transpose(4, 0, 1, 2, 3)
    x5 = x5[:, rp:side - rp, rp:side - rp, :, :]
    si = side - 2 * rp
    x_nhwc = x5.transpose(1, 2, 3, 4, 0).reshape(si * si, side, side, d)

    def conv(a, w, b):
        y = jax.lax.conv_general_dilated(
            a, w, (1, 1), "VALID",
            dimension_numbers=("NHWC", "HWIO", "NHWC"))
        return y + b.reshape(1, 1, 1, -1)

    def gn(a, w, b, eps=1e-5):
        m = a.mean(axis=(1, 2), keepdims=True)
        v = ((a - m) ** 2).mean(axis=(1, 2), keepdims=True)
        return (a - m) * jax.lax.rsqrt(v + eps) * w.reshape(1, 1, 1, -1) \
            + b.reshape(1, 1, 1, -1)

    h = jnp.maximum(gn(conv(x_nhwc, w1_hwio, b1), gn1w, gn1b), 0.0)
    h = gn(conv(h, w2_hwio, b2), gn2w, gn2b)
    so = h.shape[1]
    return jax.nn.sigmoid(
        h.transpose(3, 0, 1, 2).reshape(1, num_heads, si * si, so * so))


# --------------------------------------------------------------------------- #
# Main
# --------------------------------------------------------------------------- #
if __name__ == "__main__":
    num_heads = 2
    side = 8                     # n_token = side^2 = 64; conv batch = 16 images
    d = num_heads * 4
    norm_init = (-2.0, 0.1)

    ks = jax.random.split(jax.random.PRNGKey(0), 12)
    rpe = jax.random.normal(ks[0], (side * side, side * side, d), jnp.float32)

    # --- 1) exact module init (conv weights = 0.02, GN defaults, peripheral
    #        init on gn2), checked against the pure-JAX lax.conv reference ---
    raw = module_init_raw(num_heads, norm_init)
    params = pack_params(**raw)
    y = jax.block_until_ready(peripheral_position_encoding(rpe, params, num_heads))
    assert y.shape == (1, num_heads, (side - 4) ** 2, (side - 4) ** 2), y.shape
    y_ref = reference_forward(rpe, num_heads=num_heads, **raw)
    # Tolerance leaves room for the MXU's f32 matmul rounding; structural /
    # indexing bugs show up as O(1e-2)+ errors and would still fail.
    np.testing.assert_allclose(np.asarray(y), np.asarray(y_ref),
                               rtol=1e-3, atol=1e-3)

    # --- 2) random weights: exercises the im2col / in-kernel window selection /
    #        GroupNorm-grouping index math (constant init would hide it) ---
    raw2 = dict(
        w1_hwio=0.1 * jax.random.normal(ks[1], (3, 3, d, d), jnp.float32),
        b1=0.1 * jax.random.normal(ks[2], (d,), jnp.float32),
        w2_hwio=0.1 * jax.random.normal(ks[3], (3, 3, d, num_heads), jnp.float32),
        b2=0.1 * jax.random.normal(ks[4], (num_heads,), jnp.float32),
        gn1w=1.0 + 0.1 * jax.random.normal(ks[5], (d,), jnp.float32),
        gn1b=0.1 * jax.random.normal(ks[6], (d,), jnp.float32),
        gn2w=0.1 + 0.05 * jax.random.normal(ks[7], (num_heads,), jnp.float32),
        gn2b=-1.0 + 0.3 * jax.random.normal(ks[8], (num_heads,), jnp.float32),
    )
    y2 = jax.block_until_ready(
        peripheral_position_encoding(rpe, pack_params(**raw2), num_heads))
    y2_ref = reference_forward(rpe, num_heads=num_heads, **raw2)
    np.testing.assert_allclose(np.asarray(y2), np.asarray(y2_ref),
                               rtol=1e-3, atol=1e-3)

    # --- 3) full MPA forward (attention in plain JAX, PPE weight map from the
    #        Pallas kernel) to exercise the module end to end ---
    bsz, n, dim = 2, (side - 4) ** 2, 8 * num_heads
    x_tok = jax.random.normal(ks[9], (bsz, n, dim), jnp.float32)
    mpa_params = dict(
        w_qkv=0.02 * jax.random.normal(ks[10], (3 * dim, dim), jnp.float32),
        w_proj=0.02 * jax.random.normal(ks[11], (dim, dim), jnp.float32),
        b_proj=jnp.zeros((dim,), jnp.float32),
    )
    out = jax.block_until_ready(
        mpa_forward(x_tok, rpe, mpa_params, params, num_heads))
    assert out.shape == (bsz, n, dim), out.shape

    print("KERNEL_OK")
</pallas_src>

<mosaic_0001>
module attributes {stable_mosaic.version = 11 : i64} {
  func.func @kernel(%arg0: i32, %arg1: memref<1x72x288xf32, #tpu.memory_space<vmem>>, %arg2: memref<8x72xf32, #tpu.memory_space<vmem>>, %arg3: memref<8x3xf32, #tpu.memory_space<vmem>>, %arg4: memref<2x72xf32, #tpu.memory_space<vmem>>, %arg5: memref<2x3xf32, #tpu.memory_space<vmem>>, %arg6: memref<288x8xf32, #tpu.memory_space<vmem>>, %arg7: memref<8x288xf32, #tpu.memory_space<vmem>>, %arg8: memref<128x8xf32, #tpu.memory_space<vmem>>, %arg9: memref<8x128xf32, #tpu.memory_space<vmem>>, %arg10: memref<1x128xi32, #tpu.memory_space<vmem>>, %arg11: memref<2x128xf32, #tpu.memory_space<vmem>>, %arg12: memref<72x128xf32, #tpu.memory_space<vmem>>) attributes {dimension_semantics = [#tpu.dimension_semantics<parallel>], iteration_bounds = array<i64: 2>, scalar_prefetch = 0 : i64, scratch_operands = 1 : i64, tpu.core_type = #tpu.core_type<tc>, window_params = [{transform_indices = @transform_0, window_bounds = array<i64: 1, 72, 288>}, {pipeline_mode = #tpu.pipeline_mode<synchronous>, transform_indices = @transform_1, window_bounds = array<i64: 8, 72>}, {pipeline_mode = #tpu.pipeline_mode<synchronous>, transform_indices = @transform_2, window_bounds = array<i64: 8, 3>}, {pipeline_mode = #tpu.pipeline_mode<synchronous>, transform_indices = @transform_3, window_bounds = array<i64: 2, 72>}, {pipeline_mode = #tpu.pipeline_mode<synchronous>, transform_indices = @transform_4, window_bounds = array<i64: 2, 3>}, {pipeline_mode = #tpu.pipeline_mode<synchronous>, transform_indices = @transform_5, window_bounds = array<i64: 288, 8>}, {pipeline_mode = #tpu.pipeline_mode<synchronous>, transform_indices = @transform_6, window_bounds = array<i64: 8, 288>}, {pipeline_mode = #tpu.pipeline_mode<synchronous>, transform_indices = @transform_7, window_bounds = array<i64: 128, 8>}, {pipeline_mode = #tpu.pipeline_mode<synchronous>, transform_indices = @transform_8, window_bounds = array<i64: 8, 128>}, {pipeline_mode = #tpu.pipeline_mode<synchronous>, transform_indices = @transform_9, window_bounds = array<i64: 1, 128>}, {transform_indices = @transform_10, window_bounds = array<i64: 2, 128>}]} {
    %c0 = arith.constant 0 : index
    %c0_0 = arith.constant 0 : index
    %0 = vector.load %arg3[%c0, %c0_0] : memref<8x3xf32, #tpu.memory_space<vmem>>, vector<8x3xf32>
    %c0_1 = arith.constant 0 : index
    %c0_2 = arith.constant 0 : index
    %1 = vector.load %arg5[%c0_1, %c0_2] : memref<2x3xf32, #tpu.memory_space<vmem>>, vector<2x3xf32>
    %c0_3 = arith.constant 0 : index
    %c0_4 = arith.constant 0 : index
    %2 = vector.load %arg2[%c0_3, %c0_4] : memref<8x72xf32, #tpu.memory_space<vmem>>, vector<8x72xf32>
    %c0_5 = arith.constant 0 : index
    %c0_6 = arith.constant 0 : index
    %c0_7 = arith.constant 0 : index
    %3 = vector.load %arg1[%c0_5, %c0_6, %c0_7] : memref<1x72x288xf32, #tpu.memory_space<vmem>>, vector<1x72x288xf32>
    %4 = vector.shape_cast %3 : vector<1x72x288xf32> to vector<72x288xf32>
    %cst = arith.constant dense<0.000000e+00> : vector<8x288xf32>
    %5 = tpu.matmul %2, %4, %cst {dimension_numbers = #tpu.dot_dimension_numbers<[1], [0], [0], [1], [0, 0, 1, 1], [], []>} : vector<8x72xf32>, vector<72x288xf32>, vector<8x288xf32> -> vector<8x288xf32>
    %6 = vector.extract_strided_slice %0 {offsets = [0, 0], sizes = [8, 1], strides = [1, 1]} : vector<8x3xf32> to vector<8x1xf32>
    %7 = vector.broadcast %6 : vector<8x1xf32> to vector<8x288xf32>
    %8 = arith.addf %5, %7 : vector<8x288xf32>
    %c0_8 = arith.constant 0 : index
    %c0_9 = arith.constant 0 : index
    %9 = vector.load %arg6[%c0_8, %c0_9] : memref<288x8xf32, #tpu.memory_space<vmem>>, vector<288x8xf32>
    %c0_10 = arith.constant 0 : index
    %c0_11 = arith.constant 0 : index
    %10 = vector.load %arg7[%c0_10, %c0_11] : memref<8x288xf32, #tpu.memory_space<vmem>>, vector<8x288xf32>
    %11 = vector.extract_strided_slice %0 {offsets = [0, 1], sizes = [8, 1], strides = [1, 1]} : vector<8x3xf32> to vector<8x1xf32>
    %12 = vector.extract_strided_slice %0 {offsets = [0, 2], sizes = [8, 1], strides = [1, 1]} : vector<8x3xf32> to vector<8x1xf32>
    %cst_12 = arith.constant dense<0.000000e+00> : vector<8x8xf32>
    %13 = tpu.matmul %8, %9, %cst_12 {dimension_numbers = #tpu.dot_dimension_numbers<[1], [0], [0], [1], [0, 0, 1, 1], [], []>} : vector<8x288xf32>, vector<288x8xf32>, vector<8x8xf32> -> vector<8x8xf32>
    %cst_13 = arith.constant 0.027777778 : f32
    %14 = vector.broadcast %cst_13 : f32 to vector<8x8xf32>
    %15 = arith.mulf %13, %14 : vector<8x8xf32>
    %cst_14 = arith.constant dense<0.000000e+00> : vector<8x288xf32>
    %16 = tpu.matmul %15, %10, %cst_14 {dimension_numbers = #tpu.dot_dimension_numbers<[1], [0], [0], [1], [0, 0, 1, 1], [], []>} : vector<8x8xf32>, vector<8x288xf32>, vector<8x288xf32> -> vector<8x288xf32>
    %17 = arith.subf %8, %16 : vector<8x288xf32>
    %18 = arith.mulf %17, %17 : vector<8x288xf32>
    %cst_15 = arith.constant dense<0.000000e+00> : vector<8x8xf32>
    %19 = tpu.matmul %18, %9, %cst_15 {dimension_numbers = #tpu.dot_dimension_numbers<[1], [0], [0], [1], [0, 0, 1, 1], [], []>} : vector<8x288xf32>, vector<288x8xf32>, vector<8x8xf32> -> vector<8x8xf32>
    %cst_16 = arith.constant 0.027777778 : f32
    %20 = vector.broadcast %cst_16 : f32 to vector<8x8xf32>
    %21 = arith.mulf %19, %20 : vector<8x8xf32>
    %cst_17 = arith.constant 9.99999974E-6 : f32
    %22 = vector.broadcast %cst_17 : f32 to vector<8x8xf32>
    %23 = arith.addf %21, %22 : vector<8x8xf32>
    %24 = math.rsqrt %23 : vector<8x8xf32>
    %25 = vector.broadcast %11 : vector<8x1xf32> to vector<8x8xf32>
    %26 = arith.mulf %25, %24 : vector<8x8xf32>
    %cst_18 = arith.constant dense<0.000000e+00> : vector<8x288xf32>
    %27 = tpu.matmul %26, %10, %cst_18 {dimension_numbers = #tpu.dot_dimension_numbers<[1], [0], [0], [1], [0, 0, 1, 1], [], []>} : vector<8x8xf32>, vector<8x288xf32>, vector<8x288xf32> -> vector<8x288xf32>
    %28 = arith.mulf %17, %27 : vector<8x288xf32>
    %29 = vector.broadcast %12 : vector<8x1xf32> to vector<8x288xf32>
    %30 = arith.addf %28, %29 : vector<8x288xf32>
    %cst_19 = arith.constant 0.000000e+00 : f32
    %31 = vector.broadcast %cst_19 : f32 to vector<8x288xf32>
    %32 = arith.maximumf %30, %31 : vector<8x288xf32>
    %33 = tpu.iota {dimensions = array<i32: 0>} : vector<288x128xi32>
    %c0_20 = arith.constant 0 : index
    %c0_21 = arith.constant 0 : index
    %34 = vector.load %arg10[%c0_20, %c0_21] : memref<1x128xi32, #tpu.memory_space<vmem>>, vector<1x128xi32>
    %35 = vector.broadcast %34 : vector<1x128xi32> to vector<288x128xi32>
    %36 = arith.subi %33, %35 : vector<288x128xi32>
    %c0_i32 = arith.constant 0 : i32
    %37 = vector.broadcast %c0_i32 : i32 to vector<288x128xi32>
    %38 = arith.cmpi eq, %36, %37 : vector<288x128xi32>
    %cst_22 = arith.constant 1.000000e+00 : f32
    %cst_23 = arith.constant 0.000000e+00 : f32
    %39 = vector.broadcast %cst_22 : f32 to vector<288x128xf32>
    %40 = vector.broadcast %cst_23 : f32 to vector<288x128xf32>
    %41 = arith.select %38, %39, %40 : vector<288x128xi1>, vector<288x128xf32>
    %cst_24 = arith.constant dense<0.000000e+00> : vector<8x128xf32>
    %42 = tpu.matmul %32, %41, %cst_24 {dimension_numbers = #tpu.dot_dimension_numbers<[1], [0], [0], [1], [0, 0, 1, 1], [], []>} : vector<8x288xf32>, vector<288x128xf32>, vector<8x128xf32> -> vector<8x128xf32>
    %c0_25 = arith.constant 0 : index
    %c0_26 = arith.constant 0 : index
    %43 = vector.load %arg12[%c0_25, %c0_26] : memref<72x128xf32, #tpu.memory_space<vmem>>, vector<8x128xf32>
    tpu.vector_store %arg12[%c0_25, %c0_26], %42 {strides = array<i32>} : memref<72x128xf32, #tpu.memory_space<vmem>>, vector<8x128xf32>,
    %c1_i32 = arith.constant 1 : i32
    %44 = vector.broadcast %c1_i32 : i32 to vector<288x128xi32>
    %45 = arith.cmpi eq, %36, %44 : vector<288x128xi32>
    %cst_27 = arith.constant 1.000000e+00 : f32
    %cst_28 = arith.constant 0.000000e+00 : f32
    %46 = vector.broadcast %cst_27 : f32 to vector<288x128xf32>
    %47 = vector.broadcast %cst_28 : f32 to vector<288x128xf32>
    %48 = arith.select %45, %46, %47 : vector<288x128xi1>, vector<288x128xf32>
    %cst_29 = arith.constant dense<0.000000e+00> : vector<8x128xf32>
    %49 = tpu.matmul %32, %48, %cst_29 {dimension_numbers = #tpu.dot_dimension_numbers<[1], [0], [0], [1], [0, 0, 1, 1], [], []>} : vector<8x288xf32>, vector<288x128xf32>, vector<8x128xf32> -> vector<8x128xf32>
    %c8 = arith.constant 8 : index
    %c0_30 = arith.constant 0 : index
    %50 = vector.load %arg12[%c8, %c0_30] : memref<72x128xf32, #tpu.memory_space<vmem>>, vector<8x128xf32>
    tpu.vector_store %arg12[%c8, %c0_30], %49 {strides = array<i32>} : memref<72x128xf32, #tpu.memory_space<vmem>>, vector<8x128xf32>,
    %c2_i32 = arith.constant 2 : i32
    %51 = vector.broadcast %c2_i32 : i32 to vector<288x128xi32>
    %52 = arith.cmpi eq, %36, %51 : vector<288x128xi32>
    %cst_31 = arith.constant 1.000000e+00 : f32
    %cst_32 = arith.constant 0.000000e+00 : f32
    %53 = vector.broadcast %cst_31 : f32 to vector<288x128xf32>
    %54 = vector.broadcast %cst_32 : f32 to vector<288x128xf32>
    %55 = arith.select %52, %53, %54 : vector<288x128xi1>, vector<288x128xf32>
    %cst_33 = arith.constant dense<0.000000e+00> : vector<8x128xf32>
    %56 = tpu.matmul %32, %55, %cst_33 {dimension_numbers = #tpu.dot_dimension_numbers<[1], [0], [0], [1], [0, 0, 1, 1], [], []>} : vector<8x288xf32>, vector<288x128xf32>, vector<8x128xf32> -> vector<8x128xf32>
    %c16 = arith.constant 16 : index
    %c0_34 = arith.constant 0 : index
    %57 = vector.load %arg12[%c16, %c0_34] : memref<72x128xf32, #tpu.memory_space<vmem>>, vector<8x128xf32>
    tpu.vector_store %arg12[%c16, %c0_34], %56 {strides = array<i32>} : memref<72x128xf32, #tpu.memory_space<vmem>>, vector<8x128xf32>,
    %c6_i32 = arith.constant 6 : i32
    %58 = vector.broadcast %c6_i32 : i32 to vector<288x128xi32>
    %59 = arith.cmpi eq, %36, %58 : vector<288x128xi32>
    %cst_35 = arith.constant 1.000000e+00 : f32
    %cst_36 = arith.constant 0.000000e+00 : f32
    %60 = vector.broadcast %cst_35 : f32 to vector<288x128xf32>
    %61 = vector.broadcast %cst_36 : f32 to vector<288x128xf32>
    %62 = arith.select %59, %60, %61 : vector<288x128xi1>, vector<288x128xf32>
    %cst_37 = arith.constant dense<0.000000e+00> : vector<8x128xf32>
    %63 = tpu.matmul %32, %62, %cst_37 {dimension_numbers = #tpu.dot_dimension_numbers<[1], [0], [0], [1], [0, 0, 1, 1], [], []>} : vector<8x288xf32>, vector<288x128xf32>, vector<8x128xf32> -> vector<8x128xf32>
    %c24 = arith.constant 24 : index
    %c0_38 = arith.constant 0 : index
    %64 = vector.load %arg12[%c24, %c0_38] : memref<72x128xf32, #tpu.memory_space<vmem>>, vector<8x128xf32>
    tpu.vector_store %arg12[%c24, %c0_38], %63 {strides = array<i32>} : memref<72x128xf32, #tpu.memory_space<vmem>>, vector<8x128xf32>,
    %c7_i32 = arith.constant 7 : i32
    %65 = vector.broadcast %c7_i32 : i32 to vector<288x128xi32>
    %66 = arith.cmpi eq, %36, %65 : vector<288x128xi32>
    %cst_39 = arith.constant 1.000000e+00 : f32
    %cst_40 = arith.constant 0.000000e+00 : f32
    %67 = vector.broadcast %cst_39 : f32 to vector<288x128xf32>
    %68 = vector.broadcast %cst_40 : f32 to vector<288x128xf32>
    %69 = arith.select %66, %67, %68 : vector<288x128xi1>, vector<288x128xf32>
    %cst_41 = arith.constant dense<0.000000e+00> : vector<8x128xf32>
    %70 = tpu.matmul %32, %69, %cst_41 {dimension_numbers = #tpu.dot_dimension_numbers<[1], [0], [0], [1], [0, 0, 1, 1], [], []>} : vector<8x288xf32>, vector<288x128xf32>, vector<8x128xf32> -> vector<8x128xf32>
    %c32 = arith.constant 32 : index
    %c0_42 = arith.constant 0 : index
    %71 = vector.load %arg12[%c32, %c0_42] : memref<72x128xf32, #tpu.memory_space<vmem>>, vector<8x128xf32>
    tpu.vector_store %arg12[%c32, %c0_42], %70 {strides = array<i32>} : memref<72x128xf32, #tpu.memory_space<vmem>>, vector<8x128xf32>,
    %c8_i32 = arith.constant 8 : i32
    %72 = vector.broadcast %c8_i32 : i32 to vector<288x128xi32>
    %73 = arith.cmpi eq, %36, %72 : vector<288x128xi32>
    %cst_43 = arith.constant 1.000000e+00 : f32
    %cst_44 = arith.constant 0.000000e+00 : f32
    %74 = vector.broadcast %cst_43 : f32 to vector<288x128xf32>
    %75 = vector.broadcast %cst_44 : f32 to vector<288x128xf32>
    %76 = arith.select %73, %74, %75 : vector<288x128xi1>, vector<288x128xf32>
    %cst_45 = arith.constant dense<0.000000e+00> : vector<8x128xf32>
    %77 = tpu.matmul %32, %76, %cst_45 {dimension_numbers = #tpu.dot_dimension_numbers<[1], [0], [0], [1], [0, 0, 1, 1], [], []>} : vector<8x288xf32>, vector<288x128xf32>, vector<8x128xf32> -> vector<8x128xf32>
    %c40 = arith.constant 40 : index
    %c0_46 = arith.constant 0 : index
    %78 = vector.load %arg12[%c40, %c0_46] : memref<72x128xf32, #tpu.memory_space<vmem>>, vector<8x128xf32>
    tpu.vector_store %arg12[%c40, %c0_46], %77 {strides = array<i32>} : memref<72x128xf32, #tpu.memory_space<vmem>>, vector<8x128xf32>,
    %c12_i32 = arith.constant 12 : i32
    %79 = vector.broadcast %c12_i32 : i32 to vector<288x128xi32>
    %80 = arith.cmpi eq, %36, %79 : vector<288x128xi32>
    %cst_47 = arith.constant 1.000000e+00 : f32
    %cst_48 = arith.constant 0.000000e+00 : f32
    %81 = vector.broadcast %cst_47 : f32 to vector<288x128xf32>
    %82 = vector.broadcast %cst_48 : f32 to vector<288x128xf32>
    %83 = arith.select %80, %81, %82 : vector<288x128xi1>, vector<288x128xf32>
    %cst_49 = arith.constant dense<0.000000e+00> : vector<8x128xf32>
    %84 = tpu.matmul %32, %83, %cst_49 {dimension_numbers = #tpu.dot_dimension_numbers<[1], [0], [0], [1], [0, 0, 1, 1], [], []>} : vector<8x288xf32>, vector<288x128xf32>, vector<8x128xf32> -> vector<8x128xf32>
    %c48 = arith.constant 48 : index
    %c0_50 = arith.constant 0 : index
    %85 = vector.load %arg12[%c48, %c0_50] : memref<72x128xf32, #tpu.memory_space<vmem>>, vector<8x128xf32>
    tpu.vector_store %arg12[%c48, %c0_50], %84 {strides = array<i32>} : memref<72x128xf32, #tpu.memory_space<vmem>>, vector<8x128xf32>,
    %c13_i32 = arith.constant 13 : i32
    %86 = vector.broadcast %c13_i32 : i32 to vector<288x128xi32>
    %87 = arith.cmpi eq, %36, %86 : vector<288x128xi32>
    %cst_51 = arith.constant 1.000000e+00 : f32
    %cst_52 = arith.constant 0.000000e+00 : f32
    %88 = vector.broadcast %cst_51 : f32 to vector<288x128xf32>
    %89 = vector.broadcast %cst_52 : f32 to vector<288x128xf32>
    %90 = arith.select %87, %88, %89 : vector<288x128xi1>, vector<288x128xf32>
    %cst_53 = arith.constant dense<0.000000e+00> : vector<8x128xf32>
    %91 = tpu.matmul %32, %90, %cst_53 {dimension_numbers = #tpu.dot_dimension_numbers<[1], [0], [0], [1], [0, 0, 1, 1], [], []>} : vector<8x288xf32>, vector<288x128xf32>, vector<8x128xf32> -> vector<8x128xf32>
    %c56 = arith.constant 56 : index
    %c0_54 = arith.constant 0 : index
    %92 = vector.load %arg12[%c56, %c0_54] : memref<72x128xf32, #tpu.memory_space<vmem>>, vector<8x128xf32>
    tpu.vector_store %arg12[%c56, %c0_54], %91 {strides = array<i32>} : memref<72x128xf32, #tpu.memory_space<vmem>>, vector<8x128xf32>,
    %c14_i32 = arith.constant 14 : i32
    %93 = vector.broadcast %c14_i32 : i32 to vector<288x128xi32>
    %94 = arith.cmpi eq, %36, %93 : vector<288x128xi32>
    %cst_55 = arith.constant 1.000000e+00 : f32
    %cst_56 = arith.constant 0.000000e+00 : f32
    %95 = vector.broadcast %cst_55 : f32 to vector<288x128xf32>
    %96 = vector.broadcast %cst_56 : f32 to vector<288x128xf32>
    %97 = arith.select %94, %95, %96 : vector<288x128xi1>, vector<288x128xf32>
    %cst_57 = arith.constant dense<0.000000e+00> : vector<8x128xf32>
    %98 = tpu.matmul %32, %97, %cst_57 {dimension_numbers = #tpu.dot_dimension_numbers<[1], [0], [0], [1], [0, 0, 1, 1], [], []>} : vector<8x288xf32>, vector<288x128xf32>, vector<8x128xf32> -> vector<8x128xf32>
    %c64 = arith.constant 64 : index
    %c0_58 = arith.constant 0 : index
    %99 = vector.load %arg12[%c64, %c0_58] : memref<72x128xf32, #tpu.memory_space<vmem>>, vector<8x128xf32>
    tpu.vector_store %arg12[%c64, %c0_58], %98 {strides = array<i32>} : memref<72x128xf32, #tpu.memory_space<vmem>>, vector<8x128xf32>,
    %c0_59 = arith.constant 0 : index
    %c0_60 = arith.constant 0 : index
    %100 = vector.load %arg4[%c0_59, %c0_60] : memref<2x72xf32, #tpu.memory_space<vmem>>, vector<2x72xf32>
    %c0_61 = arith.constant 0 : index
    %c0_62 = arith.constant 0 : index
    %101 = vector.load %arg12[%c0_61, %c0_62] : memref<72x128xf32, #tpu.memory_space<vmem>>, vector<72x128xf32>
    %cst_63 = arith.constant dense<0.000000e+00> : vector<2x128xf32>
    %102 = tpu.matmul %100, %101, %cst_63 {dimension_numbers = #tpu.dot_dimension_numbers<[1], [0], [0], [1], [0, 0, 1, 1], [], []>} : vector<2x72xf32>, vector<72x128xf32>, vector<2x128xf32> -> vector<2x128xf32>
    %103 = vector.extract_strided_slice %1 {offsets = [0, 0], sizes = [2, 1], strides = [1, 1]} : vector<2x3xf32> to vector<2x1xf32>
    %104 = vector.broadcast %103 : vector<2x1xf32> to vector<2x128xf32>
    %105 = arith.addf %102, %104 : vector<2x128xf32>
    %c0_64 = arith.constant 0 : index
    %c0_65 = arith.constant 0 : index
    %106 = vector.load %arg8[%c0_64, %c0_65] : memref<128x8xf32, #tpu.memory_space<vmem>>, vector<128x8xf32>
    %c0_66 = arith.constant 0 : index
    %c0_67 = arith.constant 0 : index
    %107 = vector.load %arg9[%c0_66, %c0_67] : memref<8x128xf32, #tpu.memory_space<vmem>>, vector<8x128xf32>
    %108 = vector.extract_strided_slice %1 {offsets = [0, 1], sizes = [2, 1], strides = [1, 1]} : vector<2x3xf32> to vector<2x1xf32>
    %109 = vector.extract_strided_slice %1 {offsets = [0, 2], sizes = [2, 1], strides = [1, 1]} : vector<2x3xf32> to vector<2x1xf32>
    %cst_68 = arith.constant dense<0.000000e+00> : vector<2x8xf32>
    %110 = tpu.matmul %105, %106, %cst_68 {dimension_numbers = #tpu.dot_dimension_numbers<[1], [0], [0], [1], [0, 0, 1, 1], [], []>} : vector<2x128xf32>, vector<128x8xf32>, vector<2x8xf32> -> vector<2x8xf32>
    %cst_69 = arith.constant 6.250000e-02 : f32
    %111 = vector.broadcast %cst_69 : f32 to vector<2x8xf32>
    %112 = arith.mulf %110, %111 : vector<2x8xf32>
    %cst_70 = arith.constant dense<0.000000e+00> : vector<2x128xf32>
    %113 = tpu.matmul %112, %107, %cst_70 {dimension_numbers = #tpu.dot_dimension_numbers<[1], [0], [0], [1], [0, 0, 1, 1], [], []>} : vector<2x8xf32>, vector<8x128xf32>, vector<2x128xf32> -> vector<2x128xf32>
    %114 = arith.subf %105, %113 : vector<2x128xf32>
    %115 = arith.mulf %114, %114 : vector<2x128xf32>
    %cst_71 = arith.constant dense<0.000000e+00> : vector<2x8xf32>
    %116 = tpu.matmul %115, %106, %cst_71 {dimension_numbers = #tpu.dot_dimension_numbers<[1], [0], [0], [1], [0, 0, 1, 1], [], []>} : vector<2x128xf32>, vector<128x8xf32>, vector<2x8xf32> -> vector<2x8xf32>
    %cst_72 = arith.constant 6.250000e-02 : f32
    %117 = vector.broadcast %cst_72 : f32 to vector<2x8xf32>
    %118 = arith.mulf %116, %117 : vector<2x8xf32>
    %cst_73 = arith.constant 9.99999974E-6 : f32
    %119 = vector.broadcast %cst_73 : f32 to vector<2x8xf32>
    %120 = arith.addf %118, %119 : vector<2x8xf32>
    %121 = math.rsqrt %120 : vector<2x8xf32>
    %122 = vector.broadcast %108 : vector<2x1xf32> to vector<2x8xf32>
    %123 = arith.mulf %122, %121 : vector<2x8xf32>
    %cst_74 = arith.constant dense<0.000000e+00> : vector<2x128xf32>
    %124 = tpu.matmul %123, %107, %cst_74 {dimension_numbers = #tpu.dot_dimension_numbers<[1], [0], [0], [1], [0, 0, 1, 1], [], []>} : vector<2x8xf32>, vector<8x128xf32>, vector<2x128xf32> -> vector<2x128xf32>
    %125 = arith.mulf %114, %124 : vector<2x128xf32>
    %126 = vector.broadcast %109 : vector<2x1xf32> to vector<2x128xf32>
    %127 = arith.addf %125, %126 : vector<2x128xf32>
    %128 = arith.negf %127 : vector<2x128xf32>
    %129 = math.exp %128 : vector<2x128xf32>
    %cst_75 = arith.constant 1.000000e+00 : f32
    %130 = vector.broadcast %cst_75 : f32 to vector<2x128xf32>
    %131 = arith.addf %130, %129 : vector<2x128xf32>
    %132 = arith.divf %130, %131 : vector<2x128xf32>
    %c0_76 = arith.constant 0 : index
    %c0_77 = arith.constant 0 : index
    %133 = vector.load %arg11[%c0_76, %c0_77] : memref<2x128xf32, #tpu.memory_space<vmem>>, vector<2x128xf32>
    tpu.vector_store %arg11[%c0_76, %c0_77], %132 {strides = array<i32>} : memref<2x128xf32, #tpu.memory_space<vmem>>, vector<2x128xf32>,
    return
  }
  func.func @transform_0(%arg0: i32) -> (i32, i32, i32) {
    %c0_i32 = arith.constant 0 : i32
    %c0_i32_0 = arith.constant 0 : i32
    %c0_i32_1 = arith.constant 0 : i32
    return %arg0, %c0_i32, %c0_i32_0 : i32, i32, i32
  }
  func.func @transform_1(%arg0: i32) -> (i32, i32) {
    %c0_i32 = arith.constant 0 : i32
    %c0_i32_0 = arith.constant 0 : i32
    %c0_i32_1 = arith.constant 0 : i32
    return %c0_i32, %c0_i32_0 : i32, i32
  }
  func.func @transform_2(%arg0: i32) -> (i32, i32) {
    %c0_i32 = arith.constant 0 : i32
    %c0_i32_0 = arith.constant 0 : i32
    %c0_i32_1 = arith.constant 0 : i32
    return %c0_i32, %c0_i32_0 : i32, i32
  }
  func.func @transform_3(%arg0: i32) -> (i32, i32) {
    %c0_i32 = arith.constant 0 : i32
    %c0_i32_0 = arith.constant 0 : i32
    %c0_i32_1 = arith.constant 0 : i32
    return %c0_i32, %c0_i32_0 : i32, i32
  }
  func.func @transform_4(%arg0: i32) -> (i32, i32) {
    %c0_i32 = arith.constant 0 : i32
    %c0_i32_0 = arith.constant 0 : i32
    %c0_i32_1 = arith.constant 0 : i32
    return %c0_i32, %c0_i32_0 : i32, i32
  }
  func.func @transform_5(%arg0: i32) -> (i32, i32) {
    %c0_i32 = arith.constant 0 : i32
    %c0_i32_0 = arith.constant 0 : i32
    %c0_i32_1 = arith.constant 0 : i32
    return %c0_i32, %c0_i32_0 : i32, i32
  }
  func.func @transform_6(%arg0: i32) -> (i32, i32) {
    %c0_i32 = arith.constant 0 : i32
    %c0_i32_0 = arith.constant 0 : i32
    %c0_i32_1 = arith.constant 0 : i32
    return %c0_i32, %c0_i32_0 : i32, i32
  }
  func.func @transform_7(%arg0: i32) -> (i32, i32) {
    %c0_i32 = arith.constant 0 : i32
    %c0_i32_0 = arith.constant 0 : i32
    %c0_i32_1 = arith.constant 0 : i32
    return %c0_i32, %c0_i32_0 : i32, i32
  }
  func.func @transform_8(%arg0: i32) -> (i32, i32) {
    %c0_i32 = arith.constant 0 : i32
    %c0_i32_0 = arith.constant 0 : i32
    %c0_i32_1 = arith.constant 0 : i32
    return %c0_i32, %c0_i32_0 : i32, i32
  }
  func.func @transform_9(%arg0: i32) -> (i32, i32) {
    %c0_i32 = arith.constant 0 : i32
    %c0_i32_0 = arith.constant 0 : i32
    %c0_i32_1 = arith.constant 0 : i32
    return %c0_i32, %c0_i32_0 : i32, i32
  }
  func.func @transform_10(%arg0: i32) -> (i32, i32) {
    %c0_i32 = arith.constant 0 : i32
    %c0_i32_0 = arith.constant 0 : i32
    return %c0_i32, %arg0 : i32, i32
  }
}

</mosaic_0001>

<bundles_post_ra>
// kernel: tpu_custom_call.1
= control target key start
LH: loop header
LB: loop body
LE: loop exit
PB: predicated region body
PF: predicated region fallthrough
CT: control target
= control target key end

     0   :  { %s6817_s0 = inlined_call_operand.vmem [shape: f32[2,72,288], index: 0, kind: input, shape index: {}]   ;;  %s6818_s1 = inlined_call_operand.hbm [shape: f32[8,72], index: 1, kind: input, shape index: {}]   ;;  %s6819_s2 = inlined_call_operand.vmem [shape: f32[8,3], index: 2, kind: input, shape index: {}]   ;;  %s6820_s3 = inlined_call_operand.hbm [shape: f32[2,72], index: 3, kind: input, shape index: {}]   ;;  %s6821_s4 = inlined_call_operand.hbm [shape: f32[2,3], index: 4, kind: input, shape index: {}]   ;;  %s6822_s5 = inlined_call_operand.vmem [shape: f32[288,8], index: 5, kind: input, shape index: {}]   ;;  %s6823_s6 = inlined_call_operand.hbm [shape: f32[8,288], index: 6, kind: input, shape index: {}]   ;;  %s6824_s7 = inlined_call_operand.vmem [shape: f32[128,8], index: 7, kind: input, shape index: {}]   ;;  %s6825_s8 = inlined_call_operand.hbm [shape: f32[8,128], index: 8, kind: input, shape index: {}]   ;;  %s6826_s9 = inlined_call_operand.vmem [shape: s32[1,128], index: 9, kind: input, shape index: {}]   ;;  %s6827_s10 = inlined_call_operand.hbm [shape: f32[2,256], index: 10, kind: output, shape index: {}]  }
   0x1   :  { %6831 = sst [smem:[#allocation17_spill]] %s6820_s3 }
   0x2   :  { %15 = vsyncpa [#allocation4], 0 }
   0x3   :  { %16 = vsyncpa [#allocation7], 0 }
   0x4   :  { %17 = vsyncpa [#allocation10], 0 }
   0x5   :  { %18 = vsyncpa [#allocation5], 0 }
   0x6   :  { %20 = vsyncpa [#allocation5 + $0x1], 0  ;;  %s5283_s13 = smov 0   ;;  %s5285_s14 = smov 0  }
   0x7   :  { %s5287_s15 = smov 0   ;;  %s5289_s16 = smov 0  }
   0x8 LB: > { %s5304_s17 = sadd.s32 4294967295, %s5214_s16   ;;  %s3780_s18 = sadd.s32 4294967294, %s5214_s16   ;;  %s5214_s16 = sphi %s5289_s16, %s6850_s16   ;;  %s5210_s15 = sphi %s5287_s15, %s6849_s15   ;;  %s5206_s14 = sphi %s5285_s14, %s6848_s14   ;;  %s5202_s13 = sphi %s5283_s13, %s6847_s13  }
   0x9   : > { %s5308_s19 = sadd.s32 1, %s5214_s16   ;;  %s248_s20 = sadd.s32 1, %s5210_s15 }
   0xa   : > { %s245_s21 = ssub.s32 %s5214_s16, %s5308_s19  ;;  %p258_p0 = scmp.ne.s32.totalorder %s5210_s15, %s5206_s14 }
   0xb   : > { %p246_p1 = scmp.eq.s32.totalorder %s245_s21, 0  ;;  %p259_p2 = scmp.eq.s32.totalorder %s5304_s17, 1 }
   0xc   : > { %p264_p3 = scmp.ne.s32.totalorder %s5206_s14, %s5202_s13  ;;  %p265_p4 = scmp.eq.s32.totalorder %s3780_s18, 1 }
   0xd   : > { %s5319_s22 = scalar_select %p246_p1, %s5210_s15, %s248_s20  }
   0xe   : > { %p5321_p5 = por %p259_p2, %p258_p0  ;;  %p5325_p6 = por %p265_p4, %p264_p3 }
   0xf   : > { %p3781_p7 = scmp.ge.s32.totalorder %s5214_s16, 1  ;;  %p272_p8 = scmp.lt.s32.totalorder %s5214_s16, 3 }
  0x10   : > { %s6832_s23 = scalar_select %p5321_p5, 1, 0 }
  0x11   : > { %s6833_s24 = scalar_select %p5325_p6, 1, 0 }
  0x12   : > { %p6828_p9 = scmp.eq.s32.totalorder %s5304_s17, 0  ;;  %p5332_p10 = pnand %p3781_p7, %p272_p8 }
  0x13   : > { %s5216_s26 = smov [#allocation6]   ;;  %s5217_s28 = smov [#allocation9]  }
  0x14   : > { %s6834_s25 = scalar_select %p5332_p10, 1, 0 }
  0x15   : > { %s299_s27 = sshll.u32 %s5216_s26, 4  ;;  %p4924_p11 = pneg %p5332_p10  ;;  %s300_s27 = int_to_ptr.vmem [resolvable:$true] %s299_s27 }
  0x16   : > { %s324_s29 = sshll.u32 %s5217_s28, 4  ;;  %s5218_s11 = smov [#allocation3]   ;;  %s325_s29 = int_to_ptr.vmem [resolvable:$true] %s324_s29 }
  0x17   : > { %p5340_p12 = pnand %p6828_p9, %p4924_p11  ;;  %s285_s12 = sshll.u32 %s5218_s11, 4  ;;  %s5344_s12 = int_to_ptr.vmem [resolvable:$true] %s285_s12 }
  0x18   : > { %s5023_s20 = scalar_lea.vmem %s300_s27, 32  ;;  %p5031_p3 = scmp.lt.s32.totalorder %s300_s27, %s300_s27 }
  0x19   : > { %p5348_p13 = pneg %p5340_p12  ;;  %p5024_p0 = scmp.ne.s32.totalorder %s300_s27, %s5023_s20 }
  0x1a   : > { %p5032_p4 = scmp.lt.s32.totalorder %s5023_s20, %s5023_s20 }
  0x1b   : > { %p5026_p1 = pnand %p5024_p0, %p5348_p13 }
  0x1c   : > { %p5033_p7 = por %p5032_p4, %p5031_p3 }
  0x1d   : > { %p5027_p2 = pneg %p5026_p1 }
  0x1f   : > { %p5034_p8 = pnand %p5033_p7, %p5027_p2 }
  0x21   : > { %5037 = shalt.err (!%p5034_p8)
}
  0x22   : > { %s6837_s3 = sld [smem:[#allocation17_spill]]  ;;  %s5049_s28 = scalar_lea.vmem %s325_s29, 384 }
  0x23   : > { %p5050_p11 = scmp.ne.s32.totalorder %s325_s29, %s5049_s28  ;;  %p5057_p5 = scmp.lt.s32.totalorder %s325_s29, %s325_s29 }
  0x24   : > { %p5058_p0 = scmp.lt.s32.totalorder %s5049_s28, %s5049_s28 }
  0x25   : > { %p5052_p9 = pnand %p5050_p11, %p5348_p13 }
  0x26   : > { %p5059_p1 = por %p5058_p0, %p5057_p5 }
  0x27   : > { %p5053_p6 = pneg %p5052_p9 }
  0x28   : > { %4930 = dma.hbm_to_vmem [thread:$0]  (!%p5340_p12), %s6837_s3, 32, %s300_s27, [#allocation7]  }
  0x29   : > { %p5060_p10 = pnand %p5059_p1, %p5053_p6 }
  0x2b   : > { %5063 = shalt.err (!%p5060_p10)
}
  0x2c   : > { %4936 = dma.hbm_to_vmem [thread:$0]  (!%p5340_p12), %s6823_s6, 384, %s325_s29, [#allocation10]  }
  0x2d   : > { %s5075_s27 = scalar_lea.vmem %s5344_s12, 128  ;;  %p5083_p4 = scmp.lt.s32.totalorder %s5344_s12, %s5344_s12 }
  0x2e   : > { %p5076_p2 = scmp.ne.s32.totalorder %s5344_s12, %s5075_s27  ;;  %p5084_p5 = scmp.lt.s32.totalorder %s5075_s27, %s5075_s27 }
  0x30   : > { %p5078_p3 = pnand %p5076_p2, %p5348_p13  ;;  %p5085_p6 = por %p5084_p5, %p5083_p4 }
  0x32   : > { %p5079_p9 = pneg %p5078_p3 }
  0x34   : > { %p5086_p10 = pnand %p5085_p6, %p5079_p9 }
  0x36   : > { %5089 = shalt.err (!%p5086_p10)
}
  0x37   : > { %4927 = dma.hbm_to_vmem [thread:$0]  (!%p5340_p12), %s6818_s1, 128, %s5344_s12, [#allocation4]  }
  0x38   : > { %s5219_s29 = smov [#allocation8]   ;;  %s5220_s11 = smov [#allocation11]  }
  0x39   : > { %s310_s28 = sshll.u32 %s5219_s29, 4  ;;  %s338_s20 = sshll.u32 %s5220_s11, 4  ;;  %s311_s28 = int_to_ptr.vmem [resolvable:$true] %s310_s28  ;;  %s339_s20 = int_to_ptr.vmem [resolvable:$true] %s338_s20 }
  0x3a   : > { %s5101_s3 = scalar_lea.vmem %s311_s28, 32  ;;  %p5109_p0 = scmp.lt.s32.totalorder %s311_s28, %s311_s28 }
  0x3b   : > { %p5102_p7 = scmp.ne.s32.totalorder %s311_s28, %s5101_s3  ;;  %p5110_p1 = scmp.lt.s32.totalorder %s5101_s3, %s5101_s3 }
  0x3d   : > { %p5104_p8 = pnand %p5102_p7, %p5348_p13  ;;  %p5111_p2 = por %p5110_p1, %p5109_p0 }
  0x3f   : > { %p5105_p11 = pneg %p5104_p8 }
  0x41   : > { %p5112_p3 = pnand %p5111_p2, %p5105_p11 }
  0x43   : > { %5115 = shalt.err (!%p5112_p3)
}
  0x44   : > { %4933 = dma.hbm_to_vmem [thread:$0]  (!%p5340_p12), %s6821_s4, 32, %s311_s28, [#allocation7]  }
  0x45   : > { %s5127_s12 = scalar_lea.vmem %s339_s20, 128  ;;  %p5135_p6 = scmp.lt.s32.totalorder %s339_s20, %s339_s20 }
  0x46   : > { %p5128_p9 = scmp.ne.s32.totalorder %s339_s20, %s5127_s12  ;;  %p5136_p10 = scmp.lt.s32.totalorder %s5127_s12, %s5127_s12 }
  0x48   : > { %p5130_p4 = pnand %p5128_p9, %p5348_p13  ;;  %p5137_p7 = por %p5136_p10, %p5135_p6 }
  0x4a   : > { %p5131_p5 = pneg %p5130_p4 }
  0x4c   : > { %p5138_p8 = pnand %p5137_p7, %p5131_p5 }
  0x4e   : > { %5141 = shalt.err (!%p5138_p8)
}
  0x4f   : > { %4939 = dma.hbm_to_vmem [thread:$0]  (!%p5340_p12), %s6825_s8, 128, %s339_s20, [#allocation10]  }
  0x50   : > { %p6838_p11 = scmp.ne.s32.totalorder %s6834_s25, 0 }
  0x51   : > { %p6839_p0 = scmp.eq.s32.totalorder (!%p6838_p11), %s5304_s17, 0 }
  0x52   : > { %362 = sbr.rel (%p6838_p11) target bundleno = 2573 (0xa0d), region = 60 }
  0x57   : > { %5185 = dma.done.wait (%p6839_p0), [#allocation4], 128   ;;  %p6840_p13 = pmov %p6839_p0 }
  0x58   : > { %p6841_p1 = pmov %p6839_p0 }
  0x59   : > { %5187 = vsyncadd (%p6840_p13), [#allocation4], 4294967168 }
  0x5a   : > { %5189 = dma.done.wait (%p6841_p1), [#allocation7], 64   ;;  %p6842_p2 = pmov %p6839_p0 }
  0x5b   : > { %p6843_p3 = pmov %p6839_p0 }
  0x5c   : > { %5191 = vsyncadd (%p6842_p2), [#allocation7], 4294967232 }
  0x5d   : > { %5193 = dma.done.wait (%p6843_p3), [#allocation10], 512   ;;  %p6844_p12 = pmov %p6839_p0 }
  0x5e   : > { %p416_p9 = scmp.lt.s32.totalorder %s5304_s17, 1  ;;  %v5221_v0 = vmov 0.0   ;;  %vm5222_vm0 = vmmov 0   ;;  %v5223_v1 = vmov 0   ;;  %v423_v29 = vld [vmem:[#allocation3] sm:$0xff]  ;;  %vm456_vm1 = vcmask 588800  }
  0x5f   : > { %5195 = vsyncadd (%p6844_p12), [#allocation10], 4294966784  ;;  %4648 = vmatprep.subr.mxu1 %v5221_v0  ;;  %524 = vmatprep.mubr.f32.mxu0 %v5221_v0  ;;  %v5456_v30 = vld [vmem:[%s6819_s2] sm:$0xff]  ;;  %v5461_v31 = vld [vmem:[%s6822_s5 + $0xf8] sm:$0xff]  ;;  %vm640_vm2 = vcmask 261120   ;;  %vm785_vm3 = vcmask 64512  }
  0x60   : > { %s417_s25 = scalar_select %p416_p9, %s5304_s17, 1  ;;  %4666 = vmatprep.mubr.msk.f32.mxu1 %vm5222_vm0, %v5221_v0  ;;  %4998 = vset.pattern.permute.xlu0 %v5223_v1  ;;  %v5467_v32 = vld [vmem:[%s6822_s5 + $0x78] sm:$0xff]  ;;  %v5479_v34 = vld [vmem:[%s6822_s5 + $0xf0] sm:$0xff]  ;;  %v5497_v37 = vld [vmem:[%s6822_s5 + $0xe8] sm:$0xff] }
  0x61   : > { %v5472_v33 = vld [vmem:[%s6822_s5 + $0x118] sm:$0xff]  ;;  %453 = vperm.xlu0 %4998, %v5456_v30   ;;  %v5485_v35 = vld [vmem:[%s6822_s5 + $0x70] sm:$0xff]  ;;  %v5504_v38 = vld [vmem:[%s6822_s5 + $0x68] sm:$0xff]  ;;  %s413_s11 = sand.u32 1, %s5206_s14   ;;  %s4143_s27 = sshll.u32 %s5304_s17, 5 }
  0x62   : > { %s4901_s30 = smul.u32 216, %s417_s25  ;;  %v5491_v36 = vld [vmem:[%s6822_s5 + $0x110] sm:$0xff]  ;;  %v5511_v39 = vld [vmem:[%s6822_s5 + $0xe0] sm:$0xff]  ;;  %v5525_v41 = vld [vmem:[%s6822_s5 + $0xd8] sm:$0xff]  ;;  %s3794_s20 = sshll.u32 %s413_s11, 1 }
  0x63   : > { %v5518_v40 = vld [vmem:[%s6822_s5 + $0x60] sm:$0xff]  ;;  %v5533_v42 = vld [vmem:[%s6822_s5 + $0x58] sm:$0xff]  ;;  %v5539_v43 = vld [vmem:[%s6822_s5 + $0xd0] sm:$0xff]  ;;  %s415_s21 = scalar_lea.vmem [#allocation12], %s3794_s20  ;;  %s6782_s25 = scalar_lea.hbm %s6827_s10, %s4143_s27 }
  0x64   : > { %s5416_s28 = scalar_lea.vmem %s6817_s0, %s4901_s30  ;;  %v5545_v44 = vld [vmem:[%s6822_s5 + $0x50] sm:$0xff]  ;;  %v5551_v45 = vld [vmem:[%s6822_s5 + $0xc8] sm:$0xff]  ;;  %v5563_v47 = vld [vmem:[%s6822_s5 + $0xc0] sm:$0xff]  ;;  %s3671_s12 = sshll.u32 %s415_s21, 4  ;;  %s3672_s12 = int_to_ptr.vmem [resolvable:$true] %s3671_s12 }
  0x65   : > { %v449_v2 = vld [vmem:[%s5416_s28 + $0xc8] sm:$0xff]  ;;  %v448_v3 = vld [vmem:[%s5416_s28 + $0xc0] sm:$0xff]  ;;  %v450_v4 = vld [vmem:[%s5416_s28 + $0xd0] sm:$0xff]  ;;  %s3658_s30 = scalar_lea.sflag [#allocation5], %s413_s11  ;;  %s5142_s18 = scalar_lea.vmem %s3672_s12, 32 }
  0x66   : > { %474 = vmatprep.subr.mxu0 %v449_v2  ;;  %4649 = vmatpush3.msra.mxu1 %v450_v4  ;;  %v446_v5 = vld [vmem:[%s5416_s28 + $0xb0] sm:$0xff]  ;;  %v445_v6 = vld [vmem:[%s5416_s28 + $0xa8] sm:$0xff]  ;;  %v447_v7 = vld [vmem:[%s5416_s28 + $0xb8] sm:$0xff]  ;;  %p5143_p4 = scmp.ne.s32.totalorder %s3672_s12, %s5142_s18  ;;  %p6845_p5 = scmp.ne.s32.totalorder %s6832_s23, 0 }
  0x67   : > { %475 = vmatpush1.msra.mxu0 %v448_v3  ;;  %4650 = vmatprep.subr.mxu1 %v5221_v0  ;;  %v443_v8 = vld [vmem:[%s5416_s28 + $0x98] sm:$0xff]  ;;  %v444_v9 = vld [vmem:[%s5416_s28 + $0xa0] sm:$0xff]  ;;  %v442_v10 = vld [vmem:[%s5416_s28 + $0x90] sm:$0xff]  ;;  %s5227_s29 = smov [#allocation12]  }
  0x68   : > { %476 = vmatprep.subr.mxu0 %v446_v5  ;;  %4651 = vmatpush3.msra.mxu1 %v447_v7  ;;  %v440_v11 = vld [vmem:[%s5416_s28 + $0x80] sm:$0xff]  ;;  %v441_v12 = vld [vmem:[%s5416_s28 + $0x88] sm:$0xff]  ;;  %v439_v13 = vld [vmem:[%s5416_s28 + $0x78] sm:$0xff]  ;;  %p5144_p6 = pnand %p5143_p4, %p6845_p5 }
  0x69   : > { %477 = vmatpush1.msra.mxu0 %v445_v6  ;;  %4652 = vmatprep.subr.mxu1 %v5221_v0  ;;  %v437_v14 = vld [vmem:[%s5416_s28 + $0x68] sm:$0xff]  ;;  %v438_v15 = vld [vmem:[%s5416_s28 + $0x70] sm:$0xff]  ;;  %v436_v16 = vld [vmem:[%s5416_s28 + $0x60] sm:$0xff] }
  0x6a   : > { %478 = vmatprep.subr.mxu0 %v443_v8  ;;  %4653 = vmatpush3.msra.mxu1 %v444_v9  ;;  %v434_v17 = vld [vmem:[%s5416_s28 + $0x50] sm:$0xff]  ;;  %v435_v18 = vld [vmem:[%s5416_s28 + $0x58] sm:$0xff]  ;;  %v433_v19 = vld [vmem:[%s5416_s28 + $0x48] sm:$0xff]  ;;  %p5145_p10 = pneg %p5144_p6 }
  0x6b   : > { %479 = vmatpush1.msra.mxu0 %v442_v10  ;;  %4654 = vmatprep.subr.mxu1 %v5221_v0  ;;  %v431_v20 = vld [vmem:[%s5416_s28 + $0x38] sm:$0xff]  ;;  %v432_v21 = vld [vmem:[%s5416_s28 + $0x40] sm:$0xff]  ;;  %v430_v22 = vld [vmem:[%s5416_s28 + $0x30] sm:$0xff] }
  0x6c   : > { %480 = vmatprep.subr.mxu0 %v440_v11  ;;  %4655 = vmatpush3.msra.mxu1 %v441_v12  ;;  %v428_v23 = vld [vmem:[%s5416_s28 + $0x20] sm:$0xff]  ;;  %v429_v24 = vld [vmem:[%s5416_s28 + $0x28] sm:$0xff]  ;;  %v427_v25 = vld [vmem:[%s5416_s28 + $0x18] sm:$0xff] }
  0x6d   : > { %481 = vmatpush1.msra.mxu0 %v439_v13  ;;  %4656 = vmatprep.subr.mxu1 %v5221_v0  ;;  %v425_v26 = vld [vmem:[%s5416_s28 + $0x8] sm:$0xff]  ;;  %v426_v27 = vld [vmem:[%s5416_s28 + $0x10] sm:$0xff]  ;;  %v424_v28 = vld [vmem:[%s5416_s28] sm:$0xff]  ;;  %s5146_s28 = sshll.u32 %s5227_s29, 4  ;;  %s5147_s28 = int_to_ptr.vmem [resolvable:$false] %s5146_s28 }
  0x6e   : > { %482 = vmatprep.subr.mxu0 %v437_v14  ;;  %4657 = vmatpush3.msra.mxu1 %v438_v15  ;;  %v5557_v46 = vld [vmem:[%s6822_s5 + $0x48] sm:$0xff]  ;;  %v5569_v48 = vld [vmem:[%s6822_s5 + $0x40] sm:$0xff]  ;;  %v5575_v49 = vld [vmem:[%s6822_s5 + $0xb8] sm:$0xff]  ;;  %s5148_s17 = scalar_lea.vmem %s5147_s28, 64  ;;  %p5149_p7 = scmp.lt.s32.totalorder %s3672_s12, %s5147_s28 }
  0x6f   : > { %483 = vmatpush1.msra.mxu0 %v436_v16  ;;  %4658 = vmatprep.subr.mxu1 %v5221_v0  ;;  %v5581_v50 = vld [vmem:[%s6822_s5 + $0x38] sm:$0xff]  ;;  %v5587_v51 = vld [vmem:[%s6822_s5 + $0xb0] sm:$0xff]  ;;  %v5599_v53 = vld [vmem:[%s6822_s5 + $0xa8] sm:$0xff]  ;;  %p5150_p8 = scmp.lt.s32.totalorder %s5148_s17, %s5142_s18 }
  0x70   : > { %484 = vmatprep.subr.mxu0 %v434_v17  ;;  %4659 = vmatpush3.msra.mxu1 %v435_v18  ;;  %v5593_v52 = vld [vmem:[%s6822_s5 + $0x30] sm:$0xff]  ;;  %v5605_v54 = vld [vmem:[%s6822_s5 + $0x28] sm:$0xff]  ;;  %v5611_v55 = vld [vmem:[%s6822_s5 + $0xa0] sm:$0xff] }
  0x71   : > { %485 = vmatpush1.msra.mxu0 %v433_v19  ;;  %4660 = vmatprep.subr.mxu1 %v5221_v0  ;;  %v5617_v56 = vld [vmem:[%s6822_s5 + $0x20] sm:$0xff]  ;;  %v5623_v57 = vld [vmem:[%s6822_s5 + $0x98] sm:$0xff]  ;;  %v5637_v59 = vld [vmem:[%s6822_s5 + $0x90] sm:$0xff]  ;;  %p5151_p11 = por %p5150_p8, %p5149_p7 }
  0x72   : > { %486 = vmatprep.subr.mxu0 %v431_v20  ;;  %4661 = vmatpush3.msra.mxu1 %v432_v21  ;;  %v5629_v58 = vld [vmem:[%s6822_s5 + $0x18] sm:$0xff]  ;;  %v634_v60 = vld [vmem:[%s6822_s5 + $0x108] sm:$0xff]  ;;  %v5646_v61 = vld [vmem:[%s6822_s5 + $0x10] sm:$0xff] }
  0x73   : > { %487 = vmatpush1.msra.mxu0 %v430_v22  ;;  %4662 = vmatprep.subr.mxu1 %v5221_v0  ;;  %v5653_v62 = vld [vmem:[%s6822_s5 + $0x88] sm:$0xff]  ;;  %v633_v63 = vld [vmem:[%s6822_s5 + $0x100] sm:$0xff]  ;;  %v638_v13 = vld [vmem:[#allocation9 + $0x8] sm:$0xff]  ;;  %p5152_p0 = pnand %p5151_p11, %p5145_p10 }
  0x74   : > { %488 = vmatprep.subr.mxu0 %v428_v23  ;;  %4663 = vmatpush3.msra.mxu1 %v429_v24  ;;  %v5662_v2 = vld [vmem:[%s6822_s5 + $0x8] sm:$0xff]  ;;  %v5668_v3 = vld [vmem:[%s6822_s5 + $0x80] sm:$0xff]  ;;  %v5224_v23 = vmov 1  }
  0x75   : > { %489 = vmatpush1.msra.mxu0 %v427_v25  ;;  %4664 = vmatprep.subr.mxu1 %v5221_v0  ;;  %v5673_v4 = vld [vmem:[%s6822_s5] sm:$0xff]  ;;  %v5697_v14 = vld [vmem:[#allocation9] sm:$0xff] }
  0x76   : > { %490 = vmatprep.subr.mxu0 %v425_v26  ;;  %4665 = vmatpush3.msra.mxu1 %v426_v27  ;;  %v639_v22 = vld [vmem:[#allocation9 + $0x10] sm:$0xff] }
  0x77   : > { %491 = vmatpush1.msra.mxu0 %v424_v28  ;;  %4667 = vmatmul.mubr.msk.f32.vlgmr.msra.gmra.mxu1 %vm456_vm1, %v423_v29 }
  0x78   : > { %3796 = vmatmul.mubr.msk.f32.vlgmr.msra.gmra.mxu0 %vm456_vm1, %v423_v29  ;;  %4156 = vmatprep.subr.mxu0 %v5461_v31 }
  0x79   : > { %4669 = vmatprep.subr.mxu1 %v5221_v0  ;;  %4157 = vmatpush3.msra.mxu0 %v5467_v32 }
  0x7a   : > { %4670 = vmatpush3.msra.mxu1 %v5472_v33  ;;  %4158 = vmatprep.subr.mxu0 %v5479_v34 }
  0x7b   : > { %4671 = vmatprep.subr.mxu1 %v5221_v0  ;;  %4159 = vmatpush3.msra.mxu0 %v5485_v35 }
  0x7c   : > { %4672 = vmatpush3.msra.mxu1 %v5491_v36  ;;  %4160 = vmatprep.subr.mxu0 %v5497_v37 }
  0x7d   : > { %4673 = vmatprep.subr.mxu1 %v5221_v0  ;;  %4161 = vmatpush3.msra.mxu0 %v5504_v38 }
  0x7e   : > { %4677 = vmatprep.mubr.msk.f32.mxu1 %vm5222_vm0, %v5221_v0  ;;  %4162 = vmatprep.subr.mxu0 %v5511_v39 }
  0x7f   : > { %4163 = vmatpush3.msra.mxu0 %v5518_v40  ;;  %4674 = vmatpush3.msra.mxu1 %v634_v60 }
  0x80   : > { %4164 = vmatprep.subr.mxu0 %v5525_v41  ;;  %4675 = vmatprep.subr.mxu1 %v5221_v0 }
  0x81   : > { %4165 = vmatpush3.msra.mxu0 %v5533_v42  ;;  %4676 = vmatpush3.msra.mxu1 %v633_v63 }
  0x82   : > { %4166 = vmatprep.subr.mxu0 %v5539_v43  ;;  %819 = vmatprep.subr.mxu1 %v638_v13 }
  0x83   : > { %4167 = vmatpush3.msra.mxu0 %v5545_v44  ;;  %4999 = vset.pattern.permute.xlu0 %v5224_v23 }
  0x84   : > { %4168 = vmatprep.subr.mxu0 %v5551_v45  ;;  %1083 = vperm.xlu0 %4999, %v5456_v30  }
  0x85   : > { %4169 = vmatpush3.msra.mxu0 %v5557_v46 }
  0x86   : > { %4170 = vmatprep.subr.mxu0 %v5563_v47 }
  0x87   : > { %4171 = vmatpush3.msra.mxu0 %v5569_v48 }
  0x88   : > { %4172 = vmatprep.subr.mxu0 %v5575_v49 }
  0x89   : > { %4173 = vmatpush3.msra.mxu0 %v5581_v50 }
  0x8a   : > { %4174 = vmatprep.subr.mxu0 %v5587_v51 }
  0x8b   : > { %4175 = vmatpush3.msra.mxu0 %v5593_v52 }
  0x8c   : > { %4176 = vmatprep.subr.mxu0 %v5599_v53 }
  0x8d   : > { %4177 = vmatpush3.msra.mxu0 %v5605_v54 }
  0x8e   : > { %4178 = vmatprep.subr.mxu0 %v5611_v55 }
  0x8f   : > { %4179 = vmatpush3.msra.mxu0 %v5617_v56 }
  0x90   : > { %4180 = vmatprep.subr.mxu0 %v5623_v57 }
  0x91   : > { %4181 = vmatpush3.msra.mxu0 %v5629_v58 }
  0x92   : > { %4182 = vmatprep.subr.mxu0 %v5637_v59 }
  0x93   : > { %4183 = vmatpush3.msra.mxu0 %v5646_v61 }
  0x94   : > { %4184 = vmatprep.subr.mxu0 %v5653_v62 }
  0x95   : > { %4185 = vmatpush3.msra.mxu0 %v5662_v2 }
  0x96   : > { %4186 = vmatprep.subr.mxu0 %v5668_v3 }
  0x97   : > { %4187 = vmatpush3.msra.mxu0 %v5673_v4 }
  0x98   : > { %4685 = vmatprep.subr.mxu0 %v5221_v0 }
  0xdc   : > { %v454_v5 = vpop.permute.xlu0 %453 }
 0x137   : > { %v597_v6 = vpop.f32.mrf.mxu1 }
 0x138   : > { %v526_v7 = vpop.f32.mrf.mxu0  ;;  %v5678_v8 = vadd.f32 %v597_v6, %v454_v5 }
 0x139   : > { %v4668_v9 = vpop.f32.mrf.mxu1  ;;  %v5685_v12 = vadd.f32 %v526_v7, %v454_v5 }
 0x13a   : > { %v528_v10 = vpop.f32.mrf.mxu0  ;;  %4678 = vmatmul.mubr.msk.f32.vlgmr.msra.gmra.mxu1 %vm640_vm2, %v5678_v8 }
 0x13b   : > { %v5682_v11 = vadd.f32 %v528_v10, %v454_v5  ;;  %853 = vmatprep.mubr.f32.mxu1 %v5221_v0  ;;  %820 = vmatpush1.msra.mxu1 %v5697_v14 }
 0x13c   : > { %4680 = vmatprep.subr.mxu1 %v5221_v0 }
 0x13d   : > { %708 = vmatprep.mubr.f32.mxu0 %v5682_v11 }
 0x13e   : > { %709 = vmatmul.mubr.f32.vlgmr.msra.gmra.mxu0 %v5685_v12 }
 0x13f   : > { %4686 = vmatpush3.msra.mxu0 %v5472_v33  ;;  %4693 = vmatprep.mubr.msk.f32.mxu0 %vm5222_vm0, %v5221_v0 }
 0x140   : > { %4687 = vmatprep.subr.mxu0 %v5221_v0 }
 0x141   : > { %4688 = vmatpush3.msra.mxu0 %v5491_v36  ;;  %v5225_v36 = vmov 2  }
 0x142   : > { %4689 = vmatprep.subr.mxu0 %v5221_v0  ;;  %5000 = vset.pattern.permute.xlu1 %v5225_v36 }
 0x143   : > { %4690 = vmatpush3.msra.mxu0 %v634_v60  ;;  %5003 = vset.pattern.permute.xlu0 %v5225_v36 }
 0x144   : > { %4691 = vmatprep.subr.mxu0 %v5221_v0  ;;  %1235 = vperm.xlu1 %5000, %v5456_v30  }
 0x145   : > { %4692 = vmatpush3.msra.mxu0 %v633_v63 }
 0x146   : > { %4696 = vmatprep.subr.mxu0 %v5221_v0 }
 0x148   : > { %5001 = vset.pattern.permute.xlu1 %v5223_v1 }
 0x1fa   : > { %v780_v15 = vpop.f32.mrf.mxu1 }
 0x1fc   : > { %v4679_v16 = vpop.f32.mrf.mxu1 }
 0x1fe   : > { %v4188_v17 = vpop.f32.mrf.mxu0 }
 0x200   : > { %v4189_v18 = vpop.f32.mrf.mxu0 }
 0x201   : > { %v4190_v19 = vadd.f32 %v4189_v18, %v4188_v17 }
 0x203   : > { %v781_v20 = vadd.f32 %v4190_v19, %v780_v15 }
 0x205   : > { %v784_v21 = vmul.f32 0.027777778, %v781_v20 }
 0x207   : > { %3799 = vmatmul.mubr.msk.f32.vlgmr.msra.gmra.mxu1 %vm785_vm3, %v784_v21 }
 0x208   : > { %4681 = vmatpush3.msra.mxu1 %v639_v22  ;;  %4682 = vmatprep.mubr.msk.f32.mxu1 %vm5222_vm0, %v5221_v0 }
 0x209   : > { %4198 = vmatprep.subr.mxu1 %v5461_v31 }
 0x20b   : > { %4683 = vmatmul.mubr.msk.f32.vlgmr.msra.gmra.mxu1 %vm785_vm3, %v784_v21 }
 0x20c   : > { %4199 = vmatpush3.msra.mxu1 %v5467_v32 }
 0x20d   : > { %4200 = vmatprep.subr.mxu1 %v5479_v34 }
 0x20e   : > { %4201 = vmatpush3.msra.mxu1 %v5485_v35  ;;  %v1244_v35 = vlaneseq }
 0x20f   : > { %4202 = vmatprep.subr.mxu1 %v5497_v37 }
 0x210   : > { %4203 = vmatpush3.msra.mxu1 %v5504_v38  ;;  %v5761_v37 = vshrl.u32 %v1244_v35, 7  ;;  %v5766_v38 = vld [vmem:[%s6826_s9] ss:$0 sm:$0xff] }
 0x211   : > { %4204 = vmatprep.subr.mxu1 %v5511_v39 }
 0x212   : > { %4205 = vmatpush3.msra.mxu1 %v5518_v40  ;;  %v1276_v39 = vadd.s32 248, %v5761_v37  ;;  %v1275_v1 = vadd.s32 240, %v5761_v37  ;;  %v1257_v60 = vadd.s32 96, %v5761_v37  ;;  %v1271_v6 = vadd.s32 208, %v5761_v37 }
 0x213   : > { %4206 = vmatprep.subr.mxu1 %v5525_v41  ;;  %v5226_v41 = vmov 1.0   ;;  %v1270_v10 = vadd.s32 200, %v5761_v37  ;;  %v1253_v16 = vadd.s32 64, %v5761_v37  ;;  %v1268_v18 = vadd.s32 184, %v5761_v37 }
 0x214   : > { %4207 = vmatpush3.msra.mxu1 %v5533_v42  ;;  %v5770_v40 = vsub.s32 %v1276_v39, %v5766_v38  ;;  %v5814_v7 = vsub.s32 %v1257_v60, %v5766_v38  ;;  %v1252_v20 = vadd.s32 56, %v5761_v37  ;;  %v1265_v35 = vadd.s32 160, %v5761_v37 }
 0x215   : > { %4208 = vmatprep.subr.mxu1 %v5539_v43  ;;  %v5848_v17 = vsub.s32 %v1270_v10, %v5766_v38  ;;  %v1262_v60 = vadd.s32 136, %v5761_v37 }
 0x216   : > { %4209 = vmatpush3.msra.mxu1 %v5545_v44  ;;  %vm1353_vm4 = vcmp.eq.s32.totalorder %v5770_v40, 0  ;;  %vm1334_vm12 = vcmp.eq.s32.totalorder %v5814_v7, 0 }
 0x217   : > { %4210 = vmatprep.subr.mxu1 %v5551_v45 }
 0x218   : > { %4211 = vmatpush3.msra.mxu1 %v5557_v46 }
 0x219   : > { %4212 = vmatprep.subr.mxu1 %v5563_v47 }
 0x21a   : > { %4213 = vmatpush3.msra.mxu1 %v5569_v48 }
 0x21b   : > { %4214 = vmatprep.subr.mxu1 %v5575_v49  ;;  %v1260_v49 = vadd.s32 120, %v5761_v37 }
 0x21c   : > { %4215 = vmatpush3.msra.mxu1 %v5581_v50  ;;  %v1280_v50 = vadd.s32 280, %v5761_v37 }
 0x21d   : > { %4216 = vmatprep.subr.mxu1 %v5587_v51  ;;  %v1259_v51 = vadd.s32 112, %v5761_v37 }
 0x21e   : > { %4217 = vmatpush3.msra.mxu1 %v5593_v52  ;;  %v1274_v52 = vadd.s32 232, %v5761_v37 }
 0x21f   : > { %4218 = vmatprep.subr.mxu1 %v5599_v53  ;;  %v1258_v53 = vadd.s32 104, %v5761_v37 }
 0x220   : > { %4219 = vmatpush3.msra.mxu1 %v5605_v54  ;;  %v5782_v54 = vsub.s32 %v1260_v49, %v5766_v38 }
 0x221   : > { %4220 = vmatprep.subr.mxu1 %v5611_v55  ;;  %v5785_v55 = vsub.s32 %v1280_v50, %v5766_v38  ;;  %v5799_v63 = vsub.s32 %v1258_v53, %v5766_v38  ;;  %v1263_v50 = vadd.s32 144, %v5761_v37 }
 0x222   : > { %4221 = vmatpush3.msra.mxu1 %v5617_v56  ;;  %v1084_v56 = vpop.permute.xlu0 %1083  ;;  %vm1337_vm5 = vcmp.eq.s32.totalorder %v5782_v54, 0 }
 0x223   : > { %4222 = vmatprep.subr.mxu1 %v5623_v57  ;;  %v5788_v57 = vsub.s32 %v1275_v1, %v5766_v38  ;;  %vm1357_vm6 = vcmp.eq.s32.totalorder %v5785_v55, 0  ;;  %vm1335_vm10 = vcmp.eq.s32.totalorder %v5799_v63, 0  ;;  %v1278_v1 = vadd.s32 264, %v5761_v37 }
 0x224   : > { %4223 = vmatpush3.msra.mxu1 %v5629_v58  ;;  %v1273_v58 = vadd.s32 224, %v5761_v37  ;;  %v5942_v53 = vsub.s32 %v1263_v50, %v5766_v38 }
 0x225   : > { %4224 = vmatprep.subr.mxu1 %v5637_v59  ;;  %v5792_v59 = vsub.s32 %v1259_v51, %v5766_v38  ;;  %vm1352_vm7 = vcmp.eq.s32.totalorder %v5788_v57, 0 }
 0x226   : > { %4225 = vmatpush3.msra.mxu1 %v5646_v61  ;;  %v5807_v5 = vsub.s32 %v1273_v58, %v5766_v38 }
 0x227   : > { %4226 = vmatprep.subr.mxu1 %v5653_v62  ;;  %v5796_v62 = vsub.s32 %v1274_v52, %v5766_v38  ;;  %vm1336_vm8 = vcmp.eq.s32.totalorder %v5792_v59, 0  ;;  %v1247_v52 = vadd.s32 16, %v5761_v37 }
 0x228   : > { %4227 = vmatpush3.msra.mxu1 %v5662_v2  ;;  %v1272_v2 = vadd.s32 216, %v5761_v37  ;;  %vm1350_vm11 = vcmp.eq.s32.totalorder %v5807_v5, 0 }
 0x229   : > { %4228 = vmatprep.subr.mxu1 %v5668_v3  ;;  %vm1351_vm9 = vcmp.eq.s32.totalorder %v5796_v62, 0  ;;  %v5951_v58 = vsub.s32 %v1247_v52, %v5766_v38 }
 0x22a   : > { %4229 = vmatpush3.msra.mxu1 %v5673_v4  ;;  %v1256_v4 = vadd.s32 88, %v5761_v37  ;;  %v5820_v9 = vsub.s32 %v1272_v2, %v5766_v38  ;;  %v1246_v2 = vadd.s32 8, %v5761_v37 }
 0x22b   : > { %1120 = vmatprep.subr.mxu1 %v638_v13  ;;  %v5834_v13 = vsub.s32 %v1271_v6, %v5766_v38 }
 0x22c   : > { %vm1349_vm13 = vcmp.eq.s32.totalorder %v5820_v9, 0 }
 0x22d   : > { %vm1348_vm15 = vcmp.eq.s32.totalorder %v5834_v13, 0 }
 0x2c7   : > { %v855_v24 = vpop.f32.mrf.mxu1 }
 0x2c8   : > { %v5740_v25 = vsub.f32 %v5685_v12, %v855_v24  ;;  %v1254_v12 = vadd.s32 72, %v5761_v37  ;;  %v5866_v24 = vsub.s32 %v1253_v16, %v5766_v38 }
 0x2c9   : > { %v857_v26 = vpop.f32.mrf.mxu1 }
 0x2ca   : > { %v5743_v27 = vsub.f32 %v5682_v11, %v857_v26  ;;  %v933_v32 = vmul.f32 %v5740_v25, %v5740_v25  ;;  %v5827_v11 = vsub.s32 %v1256_v4, %v5766_v38  ;;  %v5854_v19 = vsub.s32 %v1254_v12, %v5766_v38 }
 0x2cb   : > { %v926_v28 = vpop.f32.mrf.mxu1  ;;  %v1251_v26 = vadd.s32 48, %v5761_v37  ;;  %v5965_v4 = vsub.s32 %v1262_v60, %v5766_v38  ;;  %v5987_v12 = vsub.s32 %v5761_v37, %v5766_v38 }
 0x2cc   : > { %v934_v29 = vmul.f32 %v5743_v27, %v5743_v27  ;;  %v5748_v31 = vsub.f32 %v5678_v8, %v926_v28  ;;  %v1255_v8 = vadd.s32 80, %v5761_v37  ;;  %vm1333_vm14 = vcmp.eq.s32.totalorder %v5827_v11, 0 }
 0x2cd   : > { %v4684_v33 = vpop.f32.mrf.mxu1  ;;  %v5872_v28 = vsub.s32 %v1268_v18, %v5766_v38  ;;  %v5890_v36 = vsub.s32 %v1251_v26, %v5766_v38 }
 0x2ce   : > { %v935_v34 = vmul.f32 %v5748_v31, %v5748_v31  ;;  %1003 = vmatprep.mubr.f32.mxu1 %v934_v29  ;;  %v5842_v15 = vsub.s32 %v1255_v8, %v5766_v38  ;;  %v1266_v29 = vadd.s32 168, %v5761_v37  ;;  %v1250_v33 = vadd.s32 40, %v5761_v37 }
 0x2cf   : > { %1004 = vmatmul.mubr.f32.vlgmr.msra.gmra.mxu1 %v933_v32  ;;  %v5878_v32 = vsub.s32 %v1252_v20, %v5766_v38  ;;  %v5973_v8 = vsub.s32 %v1246_v2, %v5766_v38 }
 0x2d0   : > { %4694 = vmatmul.mubr.msk.f32.vlgmr.msra.gmra.mxu0 %vm640_vm2, %v935_v34  ;;  %1121 = vmatpush1.msra.mxu1 %v5697_v14  ;;  %v1269_v14 = vadd.s32 192, %v5761_v37  ;;  %v5895_v39 = vsub.s32 %v1266_v29, %v5766_v38 }
 0x2d1   : > { %1154 = vmatprep.mubr.f32.mxu1 %v5221_v0  ;;  %4697 = vmatpush3.msra.mxu0 %v639_v22  ;;  %v1267_v22 = vadd.s32 176, %v5761_v37 }
 0x2d2   : > { %4698 = vmatprep.mubr.msk.f32.mxu0 %vm5222_vm0, %v5221_v0  ;;  %4701 = vmatprep.subr.mxu1 %v5221_v0  ;;  %v5860_v21 = vsub.s32 %v1269_v14, %v5766_v38  ;;  %v1236_v14 = vpop.permute.xlu1 %1235 }
 0x2d3   : > { %4240 = vmatprep.subr.msk.mxu0 %vm1353_vm4, %v5226_v41  ;;  %vm1332_vm4 = vcmp.eq.s32.totalorder %v5842_v15, 0  ;;  %v5884_v34 = vsub.s32 %v1267_v22, %v5766_v38 }
 0x38f   : > { %v4230_v30 = vpop.f32.mrf.mxu1 }
 0x390   : > { %v1075_v42 = vpop.f32.mrf.mxu0 }
 0x391   : > { %v4231_v43 = vpop.f32.mrf.mxu1 }
 0x392   : > { %v4232_v44 = vadd.f32 %v4231_v43, %v4230_v30  ;;  %v4695_v45 = vpop.f32.mrf.mxu0  ;;  %v5900_v30 = vsub.s32 %v1250_v33, %v5766_v38  ;;  %v1249_v43 = vadd.s32 32, %v5761_v37 }
 0x393   : > { %v1279_v45 = vadd.s32 272, %v5761_v37 }
 0x394   : > { %v1076_v46 = vadd.f32 %v4232_v44, %v1075_v42  ;;  %v5905_v42 = vsub.s32 %v1265_v35, %v5766_v38  ;;  %v1264_v44 = vadd.s32 152, %v5761_v37 }
 0x395   : > { %v5929_v49 = vsub.s32 %v1279_v45, %v5766_v38 }
 0x396   : > { %v1079_v47 = vmul.f32 0.027777778, %v1076_v46  ;;  %v5922_v46 = vsub.s32 %v1249_v43, %v5766_v38 }
 0x398   : > { %v1080_v48 = vadd.f32 1e-05, %v1079_v47  ;;  %v1248_v47 = vadd.s32 24, %v5761_v37 }
 0x39a   : > { %5004 = vrsqrt.f32 %v1080_v48  ;;  %v5926_v48 = vsub.s32 %v1264_v44, %v5766_v38  ;;  %v5935_v51 = vsub.s32 %v1248_v47, %v5766_v38 }
 0x3a7   : > { %v5005_v61 = vpop.eup %5004 }
 0x3a8   : > { %v1086_v3 = vmul.f32 %v5005_v61, %v1084_v56  ;;  %v5945_v56 = vsub.s32 %v1278_v1, %v5766_v38  ;;  %v1277_v61 = vadd.s32 256, %v5761_v37 }
 0x3aa   : > { %3802 = vmatmul.mubr.msk.f32.vlgmr.msra.gmra.mxu1 %vm785_vm3, %v1086_v3  ;;  %4699 = vmatmul.mubr.msk.f32.vlgmr.msra.gmra.mxu0 %vm785_vm3, %v1086_v3  ;;  %v1261_v3 = vadd.s32 128, %v5761_v37  ;;  %v5968_v6 = vsub.s32 %v1277_v61, %v5766_v38 }
 0x3ab   : > { %4241 = vmatpush3.msk.msra.mxu0 %vm1337_vm5, %v5226_v41  ;;  %4702 = vmatpush3.msk.msra.mxu1 %vm1357_vm6, %v5226_v41  ;;  %vm1347_vm5 = vcmp.eq.s32.totalorder %v5848_v17, 0  ;;  %vm1331_vm6 = vcmp.eq.s32.totalorder %v5854_v19, 0 }
 0x3ac   : > { %4242 = vmatprep.subr.msk.mxu0 %vm1352_vm7, %v5226_v41  ;;  %4703 = vmatprep.subr.mxu1 %v5221_v0  ;;  %vm1346_vm7 = vcmp.eq.s32.totalorder %v5860_v21, 0  ;;  %v5976_v10 = vsub.s32 %v1261_v3, %v5766_v38 }
 0x3ad   : > { %4243 = vmatpush3.msk.msra.mxu0 %vm1336_vm8, %v5226_v41  ;;  %4709 = vmatprep.mubr.msk.f32.mxu1 %vm5222_vm0, %v5221_v0  ;;  %vm1330_vm8 = vcmp.eq.s32.totalorder %v5866_v24, 0 }
 0x3ae   : > { %4244 = vmatprep.subr.msk.mxu0 %vm1351_vm9, %v5226_v41  ;;  %vm1345_vm9 = vcmp.eq.s32.totalorder %v5872_v28, 0 }
 0x3af   : > { %4245 = vmatpush3.msk.msra.mxu0 %vm1335_vm10, %v5226_v41  ;;  %vm1329_vm10 = vcmp.eq.s32.totalorder %v5878_v32, 0 }
 0x3b0   : > { %4246 = vmatprep.subr.msk.mxu0 %vm1350_vm11, %v5226_v41  ;;  %vm1344_vm11 = vcmp.eq.s32.totalorder %v5884_v34, 0 }
 0x3b1   : > { %4247 = vmatpush3.msk.msra.mxu0 %vm1334_vm12, %v5226_v41  ;;  %vm1328_vm12 = vcmp.eq.s32.totalorder %v5890_v36, 0 }
 0x3b2   : > { %4248 = vmatprep.subr.msk.mxu0 %vm1349_vm13, %v5226_v41  ;;  %vm1343_vm13 = vcmp.eq.s32.totalorder %v5895_v39, 0 }
 0x3b3   : > { %4249 = vmatpush3.msk.msra.mxu0 %vm1333_vm14, %v5226_v41  ;;  %vm1327_vm14 = vcmp.eq.s32.totalorder %v5900_v30, 0 }
 0x3b4   : > { %4250 = vmatprep.subr.msk.mxu0 %vm1348_vm15, %v5226_v41  ;;  %vm1342_vm15 = vcmp.eq.s32.totalorder %v5905_v42, 0 }
 0x3b5   : > { %4251 = vmatpush3.msk.msra.mxu0 %vm1332_vm4, %v5226_v41  ;;  %vm1326_vm4 = vcmp.eq.s32.totalorder %v5922_v46, 0 }
 0x3b6   : > { %4252 = vmatprep.subr.msk.mxu0 %vm1347_vm5, %v5226_v41  ;;  %vm1341_vm5 = vcmp.eq.s32.totalorder %v5926_v48, 0 }
 0x3b7   : > { %4253 = vmatpush3.msk.msra.mxu0 %vm1331_vm6, %v5226_v41  ;;  %vm1356_vm6 = vcmp.eq.s32.totalorder %v5929_v49, 0 }
 0x3b8   : > { %4254 = vmatprep.subr.msk.mxu0 %vm1346_vm7, %v5226_v41  ;;  %4704 = vmatpush3.msk.msra.mxu1 %vm1356_vm6, %v5226_v41  ;;  %vm1325_vm7 = vcmp.eq.s32.totalorder %v5935_v51, 0  ;;  %vm1568_vm6 = vcmp.eq.s32.totalorder %v5788_v57, 1 }
 0x3b9   : > { %4255 = vmatpush3.msk.msra.mxu0 %vm1330_vm8, %v5226_v41  ;;  %4705 = vmatprep.subr.mxu1 %v5221_v0  ;;  %vm1340_vm8 = vcmp.eq.s32.totalorder %v5942_v53, 0 }
 0x3ba   : > { %4256 = vmatprep.subr.msk.mxu0 %vm1345_vm9, %v5226_v41  ;;  %vm1355_vm9 = vcmp.eq.s32.totalorder %v5945_v56, 0 }
 0x3bb   : > { %4257 = vmatpush3.msk.msra.mxu0 %vm1329_vm10, %v5226_v41  ;;  %4706 = vmatpush3.msk.msra.mxu1 %vm1355_vm9, %v5226_v41  ;;  %vm1324_vm10 = vcmp.eq.s32.totalorder %v5951_v58, 0  ;;  %vm1573_vm9 = vcmp.eq.s32.totalorder %v5785_v55, 1 }
 0x3bc   : > { %4258 = vmatprep.subr.msk.mxu0 %vm1344_vm11, %v5226_v41  ;;  %4707 = vmatprep.subr.mxu1 %v5221_v0  ;;  %vm1339_vm11 = vcmp.eq.s32.totalorder %v5965_v4, 0 }
 0x3bd   : > { %4259 = vmatpush3.msk.msra.mxu0 %vm1328_vm12, %v5226_v41  ;;  %vm1354_vm12 = vcmp.eq.s32.totalorder %v5968_v6, 0 }
 0x3be   : > { %4260 = vmatprep.subr.msk.mxu0 %vm1343_vm13, %v5226_v41  ;;  %vm1569_vm13 = vcmp.eq.s32.totalorder %v5770_v40, 1  ;;  %4708 = vmatpush3.msk.msra.mxu1 %vm1354_vm12, %v5226_v41  ;;  %vm1572_vm12 = vcmp.eq.s32.totalorder %v5929_v49, 1 }
 0x3bf   : > { %4261 = vmatpush3.msk.msra.mxu0 %vm1327_vm14, %v5226_v41  ;;  %vm1323_vm14 = vcmp.eq.s32.totalorder %v5973_v8, 0  ;;  %4280 = vmatprep.subr.msk.mxu1 %vm1569_vm13, %v5226_v41  ;;  %vm1550_vm13 = vcmp.eq.s32.totalorder %v5814_v7, 1 }
 0x3c0   : > { %4262 = vmatprep.subr.msk.mxu0 %vm1342_vm15, %v5226_v41  ;;  %vm1338_vm15 = vcmp.eq.s32.totalorder %v5976_v10, 0 }
 0x3c1   : > { %4263 = vmatpush3.msk.msra.mxu0 %vm1326_vm4, %v5226_v41  ;;  %vm1322_vm4 = vcmp.eq.s32.totalorder %v5987_v12, 0 }
 0x3c2   : > { %4264 = vmatprep.subr.msk.mxu0 %vm1341_vm5, %v5226_v41  ;;  %vm1553_vm5 = vcmp.eq.s32.totalorder %v5782_v54, 1 }
 0x3c3   : > { %4265 = vmatpush3.msk.msra.mxu0 %vm1325_vm7, %v5226_v41  ;;  %vm1552_vm7 = vcmp.eq.s32.totalorder %v5792_v59, 1 }
 0x3c4   : > { %4266 = vmatprep.subr.msk.mxu0 %vm1340_vm8, %v5226_v41  ;;  %vm1567_vm8 = vcmp.eq.s32.totalorder %v5796_v62, 1 }
 0x3c5   : > { %4267 = vmatpush3.msk.msra.mxu0 %vm1324_vm10, %v5226_v41  ;;  %vm1551_vm10 = vcmp.eq.s32.totalorder %v5799_v63, 1 }
 0x3c6   : > { %4268 = vmatprep.subr.msk.mxu0 %vm1339_vm11, %v5226_v41  ;;  %vm1566_vm11 = vcmp.eq.s32.totalorder %v5807_v5, 1 }
 0x3c7   : > { %4269 = vmatpush3.msk.msra.mxu0 %vm1323_vm14, %v5226_v41  ;;  %vm1565_vm14 = vcmp.eq.s32.totalorder %v5820_v9, 1 }
 0x3c8   : > { %4270 = vmatprep.subr.msk.mxu0 %vm1338_vm15, %v5226_v41  ;;  %vm1571_vm15 = vcmp.eq.s32.totalorder %v5945_v56, 1 }
 0x3c9   : > { %4271 = vmatpush3.msk.msra.mxu0 %vm1322_vm4, %v5226_v41  ;;  %vm1549_vm4 = vcmp.eq.s32.totalorder %v5827_v11, 1 }
 0x3ca   : > { %4712 = vmatprep.subr.mxu0 %v5221_v0 }
 0x46a   : > { %v1156_v16 = vpop.f32.mrf.mxu1  ;;  %v1227_v18 = vpop.f32.mrf.mxu0 }
 0x46b   : > { %v1231_v20 = vmul.f32 %v1156_v16, %v5740_v25  ;;  %v1233_v37 = vmul.f32 %v1227_v18, %v5748_v31 }
 0x46c   : > { %v1158_v38 = vpop.f32.mrf.mxu1  ;;  %v4700_v22 = vpop.f32.mrf.mxu0 }
 0x46d   : > { %v1240_v26 = vadd.f32 %v1236_v14, %v1233_v37  ;;  %v1232_v29 = vmul.f32 %v1158_v38, %v5743_v27  ;;  %v1238_v33 = vadd.f32 %v1236_v14, %v1231_v20  ;;  %v3242_v22 = vld [vmem:[#allocation6] sm:$0x3] }
 0x46f   : > { %v5998_v35 = vmax.f32 %v1240_v26, 0.0  ;;  %v1239_v43 = vadd.f32 %v1236_v14, %v1232_v29  ;;  %v6009_v25 = vmax.f32 %v1238_v33, 0.0  ;;  %v6681_v26 = vld [vmem:[%s6824_s7 + $0x78] sm:$0xff]  ;;  %v6689_v29 = vld [vmem:[%s6824_s7 + $0x70] sm:$0xff]  ;;  %v3343_v33 = vld [vmem:[%s6824_s7 + $0x68] sm:$0xff] }
 0x471   : > { %v6002_v44 = vmax.f32 %v1239_v43, 0.0  ;;  %4710 = vmatmul.mubr.msk.f32.vlgmr.msra.gmra.mxu1 %vm640_vm2, %v5998_v35  ;;  %v3341_v43 = vld [vmem:[%s6824_s7 + $0x58] sm:$0xff] }
 0x472   : > { %4281 = vmatpush3.msk.msra.mxu1 %vm1553_vm5, %v5226_v41  ;;  %vm1564_vm5 = vcmp.eq.s32.totalorder %v5834_v13, 1 }
 0x473   : > { %4282 = vmatprep.subr.msk.mxu1 %vm1568_vm6, %v5226_v41  ;;  %1461 = vmatprep.mubr.f32.mxu0 %v6002_v44  ;;  %vm1570_vm6 = vcmp.eq.s32.totalorder %v5968_v6, 1 }
 0x474   : > { %4283 = vmatpush3.msk.msra.mxu1 %vm1552_vm7, %v5226_v41  ;;  %1674 = vmatprep.mubr.f32.mxu1 %v6002_v44  ;;  %vm1548_vm7 = vcmp.eq.s32.totalorder %v5842_v15, 1 }
 0x475   : > { %1462 = vmatmul.mubr.f32.vlgmr.msra.gmra.mxu0 %v6009_v25  ;;  %4284 = vmatprep.subr.msk.mxu1 %vm1567_vm8, %v5226_v41  ;;  %vm1782_vm8 = vcmp.eq.s32.totalorder %v5770_v40, 2 }
 0x476   : > { %4713 = vmatpush3.msk.msra.mxu0 %vm1573_vm9, %v5226_v41  ;;  %4285 = vmatpush3.msk.msra.mxu1 %vm1551_vm10, %v5226_v41  ;;  %vm1563_vm9 = vcmp.eq.s32.totalorder %v5848_v17, 1  ;;  %vm1766_vm10 = vcmp.eq.s32.totalorder %v5782_v54, 2 }
 0x477   : > { %4714 = vmatprep.subr.mxu0 %v5221_v0  ;;  %4286 = vmatprep.subr.msk.mxu1 %vm1566_vm11, %v5226_v41  ;;  %vm1547_vm11 = vcmp.eq.s32.totalorder %v5854_v19, 1 }
 0x478   : > { %4715 = vmatpush3.msk.msra.mxu0 %vm1572_vm12, %v5226_v41  ;;  %4287 = vmatpush3.msk.msra.mxu1 %vm1550_vm13, %v5226_v41  ;;  %vm1781_vm12 = vcmp.eq.s32.totalorder %v5788_v57, 2  ;;  %vm1562_vm13 = vcmp.eq.s32.totalorder %v5860_v21, 1 }
 0x479   : > { %4716 = vmatprep.subr.mxu0 %v5221_v0  ;;  %4288 = vmatprep.subr.msk.mxu1 %vm1565_vm14, %v5226_v41  ;;  %vm1765_vm14 = vcmp.eq.s32.totalorder %v5792_v59, 2 }
 0x47a   : > { %4717 = vmatpush3.msk.msra.mxu0 %vm1571_vm15, %v5226_v41  ;;  %4289 = vmatpush3.msk.msra.mxu1 %vm1549_vm4, %v5226_v41  ;;  %vm1546_vm15 = vcmp.eq.s32.totalorder %v5866_v24, 1  ;;  %vm1780_vm4 = vcmp.eq.s32.totalorder %v5796_v62, 2 }
 0x47b   : > { %4718 = vmatprep.subr.mxu0 %v5221_v0  ;;  %4290 = vmatprep.subr.msk.mxu1 %vm1564_vm5, %v5226_v41  ;;  %vm1561_vm5 = vcmp.eq.s32.totalorder %v5872_v28, 1 }
 0x47c   : > { %4719 = vmatpush3.msk.msra.mxu0 %vm1570_vm6, %v5226_v41  ;;  %4720 = vmatprep.mubr.msk.f32.mxu0 %vm5222_vm0, %v5221_v0  ;;  %vm1764_vm6 = vcmp.eq.s32.totalorder %v5799_v63, 2 }
 0x47d   : > { %4291 = vmatpush3.msk.msra.mxu1 %vm1548_vm7, %v5226_v41  ;;  %4721 = vmatmul.mubr.msk.f32.vlgmr.msra.gmra.mxu0 %vm640_vm2, %v5998_v35  ;;  %vm1545_vm7 = vcmp.eq.s32.totalorder %v5878_v32, 1 }
 0x47e   : > { %4320 = vmatprep.subr.msk.mxu0 %vm1782_vm8, %v5226_v41  ;;  %4292 = vmatprep.subr.msk.mxu1 %vm1563_vm9, %v5226_v41  ;;  %vm1779_vm8 = vcmp.eq.s32.totalorder %v5807_v5, 2  ;;  %vm1560_vm9 = vcmp.eq.s32.totalorder %v5884_v34, 1 }
 0x47f   : > { %4321 = vmatpush3.msk.msra.mxu0 %vm1766_vm10, %v5226_v41  ;;  %1887 = vmatprep.mubr.f32.mxu0 %v6002_v44  ;;  %vm1763_vm10 = vcmp.eq.s32.totalorder %v5814_v7, 2 }
 0x480   : > { %4293 = vmatpush3.msk.msra.mxu1 %vm1547_vm11, %v5226_v41  ;;  %4322 = vmatprep.subr.msk.mxu0 %vm1781_vm12, %v5226_v41  ;;  %vm1544_vm11 = vcmp.eq.s32.totalorder %v5890_v36, 1  ;;  %vm1778_vm12 = vcmp.eq.s32.totalorder %v5820_v9, 2 }
 0x481   : > { %4294 = vmatprep.subr.msk.mxu1 %vm1562_vm13, %v5226_v41  ;;  %4323 = vmatpush3.msk.msra.mxu0 %vm1765_vm14, %v5226_v41  ;;  %vm1559_vm13 = vcmp.eq.s32.totalorder %v5895_v39, 1  ;;  %vm1762_vm14 = vcmp.eq.s32.totalorder %v5827_v11, 2 }
 0x482   : > { %4295 = vmatpush3.msk.msra.mxu1 %vm1546_vm15, %v5226_v41  ;;  %4324 = vmatprep.subr.msk.mxu0 %vm1780_vm4, %v5226_v41  ;;  %vm1543_vm15 = vcmp.eq.s32.totalorder %v5900_v30, 1  ;;  %vm1777_vm4 = vcmp.eq.s32.totalorder %v5834_v13, 2 }
 0x483   : > { %4296 = vmatprep.subr.msk.mxu1 %vm1561_vm5, %v5226_v41  ;;  %4325 = vmatpush3.msk.msra.mxu0 %vm1764_vm6, %v5226_v41  ;;  %vm1558_vm5 = vcmp.eq.s32.totalorder %v5905_v42, 1  ;;  %vm1761_vm6 = vcmp.eq.s32.totalorder %v5842_v15, 2 }
 0x484   : > { %4297 = vmatpush3.msk.msra.mxu1 %vm1545_vm7, %v5226_v41  ;;  %4326 = vmatprep.subr.msk.mxu0 %vm1779_vm8, %v5226_v41  ;;  %vm1542_vm7 = vcmp.eq.s32.totalorder %v5922_v46, 1  ;;  %vm1776_vm8 = vcmp.eq.s32.totalorder %v5848_v17, 2 }
 0x485   : > { %4298 = vmatprep.subr.msk.mxu1 %vm1560_vm9, %v5226_v41  ;;  %4327 = vmatpush3.msk.msra.mxu0 %vm1763_vm10, %v5226_v41  ;;  %vm1557_vm9 = vcmp.eq.s32.totalorder %v5926_v48, 1  ;;  %vm1760_vm10 = vcmp.eq.s32.totalorder %v5854_v19, 2 }
 0x486   : > { %4299 = vmatpush3.msk.msra.mxu1 %vm1544_vm11, %v5226_v41  ;;  %4328 = vmatprep.subr.msk.mxu0 %vm1778_vm12, %v5226_v41  ;;  %vm1541_vm11 = vcmp.eq.s32.totalorder %v5935_v51, 1  ;;  %vm1775_vm12 = vcmp.eq.s32.totalorder %v5860_v21, 2 }
 0x487   : > { %4300 = vmatprep.subr.msk.mxu1 %vm1559_vm13, %v5226_v41  ;;  %4329 = vmatpush3.msk.msra.mxu0 %vm1762_vm14, %v5226_v41  ;;  %vm1556_vm13 = vcmp.eq.s32.totalorder %v5942_v53, 1  ;;  %vm1759_vm14 = vcmp.eq.s32.totalorder %v5866_v24, 2 }
 0x488   : > { %4301 = vmatpush3.msk.msra.mxu1 %vm1543_vm15, %v5226_v41  ;;  %4330 = vmatprep.subr.msk.mxu0 %vm1777_vm4, %v5226_v41  ;;  %vm1540_vm15 = vcmp.eq.s32.totalorder %v5951_v58, 1  ;;  %vm1774_vm4 = vcmp.eq.s32.totalorder %v5872_v28, 2 }
 0x489   : > { %4302 = vmatprep.subr.msk.mxu1 %vm1558_vm5, %v5226_v41  ;;  %4331 = vmatpush3.msk.msra.mxu0 %vm1761_vm6, %v5226_v41  ;;  %vm1555_vm5 = vcmp.eq.s32.totalorder %v5965_v4, 1  ;;  %vm1758_vm6 = vcmp.eq.s32.totalorder %v5878_v32, 2 }
 0x48a   : > { %4303 = vmatpush3.msk.msra.mxu1 %vm1542_vm7, %v5226_v41  ;;  %4332 = vmatprep.subr.msk.mxu0 %vm1776_vm8, %v5226_v41  ;;  %vm1539_vm7 = vcmp.eq.s32.totalorder %v5973_v8, 1  ;;  %vm1773_vm8 = vcmp.eq.s32.totalorder %v5884_v34, 2 }
 0x48b   : > { %4304 = vmatprep.subr.msk.mxu1 %vm1557_vm9, %v5226_v41  ;;  %4333 = vmatpush3.msk.msra.mxu0 %vm1760_vm10, %v5226_v41  ;;  %vm1554_vm9 = vcmp.eq.s32.totalorder %v5976_v10, 1  ;;  %vm1757_vm10 = vcmp.eq.s32.totalorder %v5890_v36, 2 }
 0x48c   : > { %4305 = vmatpush3.msk.msra.mxu1 %vm1541_vm11, %v5226_v41  ;;  %4334 = vmatprep.subr.msk.mxu0 %vm1775_vm12, %v5226_v41  ;;  %vm1538_vm11 = vcmp.eq.s32.totalorder %v5987_v12, 1  ;;  %vm1772_vm12 = vcmp.eq.s32.totalorder %v5895_v39, 2 }
 0x48d   : > { %4306 = vmatprep.subr.msk.mxu1 %vm1556_vm13, %v5226_v41  ;;  %4335 = vmatpush3.msk.msra.mxu0 %vm1759_vm14, %v5226_v41  ;;  %vm1756_vm13 = vcmp.eq.s32.totalorder %v5900_v30, 2  ;;  %vm1771_vm14 = vcmp.eq.s32.totalorder %v5905_v42, 2 }
 0x48e   : > { %4307 = vmatpush3.msk.msra.mxu1 %vm1540_vm15, %v5226_v41  ;;  %4336 = vmatprep.subr.msk.mxu0 %vm1774_vm4, %v5226_v41  ;;  %vm1786_vm15 = vcmp.eq.s32.totalorder %v5785_v55, 2  ;;  %vm1755_vm4 = vcmp.eq.s32.totalorder %v5922_v46, 2 }
 0x48f   : > { %4308 = vmatprep.subr.msk.mxu1 %vm1555_vm5, %v5226_v41  ;;  %4337 = vmatpush3.msk.msra.mxu0 %vm1758_vm6, %v5226_v41  ;;  %vm1770_vm5 = vcmp.eq.s32.totalorder %v5926_v48, 2  ;;  %vm1785_vm6 = vcmp.eq.s32.totalorder %v5929_v49, 2 }
 0x490   : > { %4309 = vmatpush3.msk.msra.mxu1 %vm1539_vm7, %v5226_v41  ;;  %4338 = vmatprep.subr.msk.mxu0 %vm1773_vm8, %v5226_v41  ;;  %vm1754_vm7 = vcmp.eq.s32.totalorder %v5935_v51, 2  ;;  %vm1769_vm8 = vcmp.eq.s32.totalorder %v5942_v53, 2 }
 0x491   : > { %4310 = vmatprep.subr.msk.mxu1 %vm1554_vm9, %v5226_v41  ;;  %4339 = vmatpush3.msk.msra.mxu0 %vm1757_vm10, %v5226_v41  ;;  %vm1784_vm9 = vcmp.eq.s32.totalorder %v5945_v56, 2  ;;  %vm1753_vm10 = vcmp.eq.s32.totalorder %v5951_v58, 2 }
 0x492   : > { %4311 = vmatpush3.msk.msra.mxu1 %vm1538_vm11, %v5226_v41  ;;  %4340 = vmatprep.subr.msk.mxu0 %vm1772_vm12, %v5226_v41  ;;  %vm1768_vm11 = vcmp.eq.s32.totalorder %v5965_v4, 2  ;;  %vm1783_vm12 = vcmp.eq.s32.totalorder %v5968_v6, 2 }
 0x493   : > { %1675 = vmatmul.mubr.f32.vlgmr.msra.gmra.mxu1 %v6009_v25  ;;  %4341 = vmatpush3.msk.msra.mxu0 %vm1756_vm13, %v5226_v41  ;;  %vm1752_vm13 = vcmp.eq.s32.totalorder %v5973_v8, 2 }
 0x494   : > { %4723 = vmatprep.subr.mxu1 %v5221_v0  ;;  %4342 = vmatprep.subr.msk.mxu0 %vm1771_vm14, %v5226_v41  ;;  %vm1995_vm14 = vcmp.eq.s32.totalorder %v5770_v40, 6 }
 0x495   : > { %4724 = vmatpush3.msk.msra.mxu1 %vm1786_vm15, %v5226_v41  ;;  %4343 = vmatpush3.msk.msra.mxu0 %vm1755_vm4, %v5226_v41  ;;  %vm1767_vm15 = vcmp.eq.s32.totalorder %v5976_v10, 2  ;;  %vm1979_vm4 = vcmp.eq.s32.totalorder %v5782_v54, 6 }
 0x496   : > { %4725 = vmatprep.subr.mxu1 %v5221_v0  ;;  %4344 = vmatprep.subr.msk.mxu0 %vm1770_vm5, %v5226_v41  ;;  %vm1751_vm5 = vcmp.eq.s32.totalorder %v5987_v12, 2 }
 0x497   : > { %4726 = vmatpush3.msk.msra.mxu1 %vm1785_vm6, %v5226_v41  ;;  %4345 = vmatpush3.msk.msra.mxu0 %vm1754_vm7, %v5226_v41  ;;  %vm1994_vm6 = vcmp.eq.s32.totalorder %v5788_v57, 6  ;;  %vm1978_vm7 = vcmp.eq.s32.totalorder %v5792_v59, 6 }
 0x498   : > { %4727 = vmatprep.subr.mxu1 %v5221_v0  ;;  %4346 = vmatprep.subr.msk.mxu0 %vm1769_vm8, %v5226_v41  ;;  %vm1993_vm8 = vcmp.eq.s32.totalorder %v5796_v62, 6 }
 0x499   : > { %4728 = vmatpush3.msk.msra.mxu1 %vm1784_vm9, %v5226_v41  ;;  %4347 = vmatpush3.msk.msra.mxu0 %vm1753_vm10, %v5226_v41  ;;  %vm1999_vm9 = vcmp.eq.s32.totalorder %v5785_v55, 6  ;;  %vm1977_vm10 = vcmp.eq.s32.totalorder %v5799_v63, 6 }
 0x49a   : > { %4729 = vmatprep.subr.mxu1 %v5221_v0  ;;  %4348 = vmatprep.subr.msk.mxu0 %vm1768_vm11, %v5226_v41  ;;  %vm1992_vm11 = vcmp.eq.s32.totalorder %v5807_v5, 6 }
 0x49b   : > { %4730 = vmatpush3.msk.msra.mxu1 %vm1783_vm12, %v5226_v41  ;;  %4731 = vmatprep.mubr.msk.f32.mxu1 %vm5222_vm0, %v5221_v0  ;;  %vm1998_vm12 = vcmp.eq.s32.totalorder %v5929_v49, 6 }
 0x49c   : > { %4349 = vmatpush3.msk.msra.mxu0 %vm1752_vm13, %v5226_v41  ;;  %4732 = vmatmul.mubr.msk.f32.vlgmr.msra.gmra.mxu1 %vm640_vm2, %v5998_v35  ;;  %vm1976_vm13 = vcmp.eq.s32.totalorder %v5814_v7, 6 }
 0x49d   : > { %4360 = vmatprep.subr.msk.mxu1 %vm1995_vm14, %v5226_v41  ;;  %4350 = vmatprep.subr.msk.mxu0 %vm1767_vm15, %v5226_v41  ;;  %vm1991_vm14 = vcmp.eq.s32.totalorder %v5820_v9, 6  ;;  %vm1997_vm15 = vcmp.eq.s32.totalorder %v5945_v56, 6 }
 0x49e   : > { %4361 = vmatpush3.msk.msra.mxu1 %vm1979_vm4, %v5226_v41  ;;  %2100 = vmatprep.mubr.f32.mxu1 %v6002_v44  ;;  %vm1975_vm4 = vcmp.eq.s32.totalorder %v5827_v11, 6 }
 0x49f   : > { %4351 = vmatpush3.msk.msra.mxu0 %vm1751_vm5, %v5226_v41  ;;  %4362 = vmatprep.subr.msk.mxu1 %vm1994_vm6, %v5226_v41  ;;  %vm1990_vm5 = vcmp.eq.s32.totalorder %v5834_v13, 6  ;;  %vm1996_vm6 = vcmp.eq.s32.totalorder %v5968_v6, 6 }
 0x4a0   : > { %1888 = vmatmul.mubr.f32.vlgmr.msra.gmra.mxu0 %v6009_v25  ;;  %4363 = vmatpush3.msk.msra.mxu1 %vm1978_vm7, %v5226_v41  ;;  %vm1974_vm7 = vcmp.eq.s32.totalorder %v5842_v15, 6 }
 0x4a1   : > { %4734 = vmatprep.subr.mxu0 %v5221_v0  ;;  %4364 = vmatprep.subr.msk.mxu1 %vm1993_vm8, %v5226_v41  ;;  %vm2208_vm8 = vcmp.eq.s32.totalorder %v5770_v40, 7 }
 0x4a2   : > { %4735 = vmatpush3.msk.msra.mxu0 %vm1999_vm9, %v5226_v41  ;;  %4365 = vmatpush3.msk.msra.mxu1 %vm1977_vm10, %v5226_v41  ;;  %vm1989_vm9 = vcmp.eq.s32.totalorder %v5848_v17, 6  ;;  %vm2192_vm10 = vcmp.eq.s32.totalorder %v5782_v54, 7 }
 0x4a3   : > { %4736 = vmatprep.subr.mxu0 %v5221_v0  ;;  %4366 = vmatprep.subr.msk.mxu1 %vm1992_vm11, %v5226_v41  ;;  %vm1973_vm11 = vcmp.eq.s32.totalorder %v5854_v19, 6 }
 0x4a4   : > { %4737 = vmatpush3.msk.msra.mxu0 %vm1998_vm12, %v5226_v41  ;;  %4367 = vmatpush3.msk.msra.mxu1 %vm1976_vm13, %v5226_v41  ;;  %vm2207_vm12 = vcmp.eq.s32.totalorder %v5788_v57, 7  ;;  %vm1988_vm13 = vcmp.eq.s32.totalorder %v5860_v21, 6 }
 0x4a5   : > { %4738 = vmatprep.subr.mxu0 %v5221_v0  ;;  %4368 = vmatprep.subr.msk.mxu1 %vm1991_vm14, %v5226_v41  ;;  %vm2191_vm14 = vcmp.eq.s32.totalorder %v5792_v59, 7 }
 0x4a6   : > { %4739 = vmatpush3.msk.msra.mxu0 %vm1997_vm15, %v5226_v41  ;;  %4369 = vmatpush3.msk.msra.mxu1 %vm1975_vm4, %v5226_v41  ;;  %vm1972_vm15 = vcmp.eq.s32.totalorder %v5866_v24, 6  ;;  %vm2206_vm4 = vcmp.eq.s32.totalorder %v5796_v62, 7 }
 0x4a7   : > { %4740 = vmatprep.subr.mxu0 %v5221_v0  ;;  %4370 = vmatprep.subr.msk.mxu1 %vm1990_vm5, %v5226_v41  ;;  %vm1987_vm5 = vcmp.eq.s32.totalorder %v5872_v28, 6 }
 0x4a8   : > { %4741 = vmatpush3.msk.msra.mxu0 %vm1996_vm6, %v5226_v41  ;;  %4742 = vmatprep.mubr.msk.f32.mxu0 %vm5222_vm0, %v5221_v0  ;;  %vm2190_vm6 = vcmp.eq.s32.totalorder %v5799_v63, 7 }
 0x4a9   : > { %4371 = vmatpush3.msk.msra.mxu1 %vm1974_vm7, %v5226_v41  ;;  %4743 = vmatmul.mubr.msk.f32.vlgmr.msra.gmra.mxu0 %vm640_vm2, %v5998_v35  ;;  %vm1971_vm7 = vcmp.eq.s32.totalorder %v5878_v32, 6 }
 0x4aa   : > { %4400 = vmatprep.subr.msk.mxu0 %vm2208_vm8, %v5226_v41  ;;  %4372 = vmatprep.subr.msk.mxu1 %vm1989_vm9, %v5226_v41  ;;  %vm2205_vm8 = vcmp.eq.s32.totalorder %v5807_v5, 7  ;;  %vm1986_vm9 = vcmp.eq.s32.totalorder %v5884_v34, 6 }
 0x4ab   : > { %4401 = vmatpush3.msk.msra.mxu0 %vm2192_vm10, %v5226_v41  ;;  %2313 = vmatprep.mubr.f32.mxu0 %v6002_v44  ;;  %vm2189_vm10 = vcmp.eq.s32.totalorder %v5814_v7, 7 }
 0x4ac   : > { %4373 = vmatpush3.msk.msra.mxu1 %vm1973_vm11, %v5226_v41  ;;  %4402 = vmatprep.subr.msk.mxu0 %vm2207_vm12, %v5226_v41  ;;  %vm1970_vm11 = vcmp.eq.s32.totalorder %v5890_v36, 6  ;;  %vm2204_vm12 = vcmp.eq.s32.totalorder %v5820_v9, 7 }
 0x4ad   : > { %4374 = vmatprep.subr.msk.mxu1 %vm1988_vm13, %v5226_v41  ;;  %4403 = vmatpush3.msk.msra.mxu0 %vm2191_vm14, %v5226_v41  ;;  %vm1985_vm13 = vcmp.eq.s32.totalorder %v5895_v39, 6  ;;  %vm2188_vm14 = vcmp.eq.s32.totalorder %v5827_v11, 7 }
 0x4ae   : > { %4375 = vmatpush3.msk.msra.mxu1 %vm1972_vm15, %v5226_v41  ;;  %4404 = vmatprep.subr.msk.mxu0 %vm2206_vm4, %v5226_v41  ;;  %vm1969_vm15 = vcmp.eq.s32.totalorder %v5900_v30, 6  ;;  %vm2203_vm4 = vcmp.eq.s32.totalorder %v5834_v13, 7 }
 0x4af   : > { %4376 = vmatprep.subr.msk.mxu1 %vm1987_vm5, %v5226_v41  ;;  %4405 = vmatpush3.msk.msra.mxu0 %vm2190_vm6, %v5226_v41  ;;  %vm1984_vm5 = vcmp.eq.s32.totalorder %v5905_v42, 6  ;;  %vm2187_vm6 = vcmp.eq.s32.totalorder %v5842_v15, 7 }
 0x4b0   : > { %4377 = vmatpush3.msk.msra.mxu1 %vm1971_vm7, %v5226_v41  ;;  %4406 = vmatprep.subr.msk.mxu0 %vm2205_vm8, %v5226_v41  ;;  %vm1968_vm7 = vcmp.eq.s32.totalorder %v5922_v46, 6  ;;  %vm2202_vm8 = vcmp.eq.s32.totalorder %v5848_v17, 7 }
 0x4b1   : > { %4378 = vmatprep.subr.msk.mxu1 %vm1986_vm9, %v5226_v41  ;;  %4407 = vmatpush3.msk.msra.mxu0 %vm2189_vm10, %v5226_v41  ;;  %vm1983_vm9 = vcmp.eq.s32.totalorder %v5926_v48, 6  ;;  %vm2186_vm10 = vcmp.eq.s32.totalorder %v5854_v19, 7 }
 0x4b2   : > { %4379 = vmatpush3.msk.msra.mxu1 %vm1970_vm11, %v5226_v41  ;;  %4408 = vmatprep.subr.msk.mxu0 %vm2204_vm12, %v5226_v41  ;;  %vm1967_vm11 = vcmp.eq.s32.totalorder %v5935_v51, 6  ;;  %vm2201_vm12 = vcmp.eq.s32.totalorder %v5860_v21, 7 }
 0x4b3   : > { %4380 = vmatprep.subr.msk.mxu1 %vm1985_vm13, %v5226_v41  ;;  %4409 = vmatpush3.msk.msra.mxu0 %vm2188_vm14, %v5226_v41  ;;  %vm1982_vm13 = vcmp.eq.s32.totalorder %v5942_v53, 6  ;;  %vm2185_vm14 = vcmp.eq.s32.totalorder %v5866_v24, 7 }
 0x4b4   : > { %4381 = vmatpush3.msk.msra.mxu1 %vm1969_vm15, %v5226_v41  ;;  %4410 = vmatprep.subr.msk.mxu0 %vm2203_vm4, %v5226_v41  ;;  %vm1966_vm15 = vcmp.eq.s32.totalorder %v5951_v58, 6  ;;  %vm2200_vm4 = vcmp.eq.s32.totalorder %v5872_v28, 7 }
 0x4b5   : > { %4382 = vmatprep.subr.msk.mxu1 %vm1984_vm5, %v5226_v41  ;;  %4411 = vmatpush3.msk.msra.mxu0 %vm2187_vm6, %v5226_v41  ;;  %vm1981_vm5 = vcmp.eq.s32.totalorder %v5965_v4, 6  ;;  %vm2184_vm6 = vcmp.eq.s32.totalorder %v5878_v32, 7 }
 0x4b6   : > { %4383 = vmatpush3.msk.msra.mxu1 %vm1968_vm7, %v5226_v41  ;;  %4412 = vmatprep.subr.msk.mxu0 %vm2202_vm8, %v5226_v41  ;;  %vm1965_vm7 = vcmp.eq.s32.totalorder %v5973_v8, 6  ;;  %vm2199_vm8 = vcmp.eq.s32.totalorder %v5884_v34, 7 }
 0x4b7   : > { %4384 = vmatprep.subr.msk.mxu1 %vm1983_vm9, %v5226_v41  ;;  %4413 = vmatpush3.msk.msra.mxu0 %vm2186_vm10, %v5226_v41  ;;  %vm1980_vm9 = vcmp.eq.s32.totalorder %v5976_v10, 6  ;;  %vm2183_vm10 = vcmp.eq.s32.totalorder %v5890_v36, 7 }
 0x4b8   : > { %4385 = vmatpush3.msk.msra.mxu1 %vm1967_vm11, %v5226_v41  ;;  %4414 = vmatprep.subr.msk.mxu0 %vm2201_vm12, %v5226_v41  ;;  %vm1964_vm11 = vcmp.eq.s32.totalorder %v5987_v12, 6  ;;  %vm2198_vm12 = vcmp.eq.s32.totalorder %v5895_v39, 7 }
 0x4b9   : > { %4386 = vmatprep.subr.msk.mxu1 %vm1982_vm13, %v5226_v41  ;;  %4415 = vmatpush3.msk.msra.mxu0 %vm2185_vm14, %v5226_v41  ;;  %vm2182_vm13 = vcmp.eq.s32.totalorder %v5900_v30, 7  ;;  %vm2197_vm14 = vcmp.eq.s32.totalorder %v5905_v42, 7 }
 0x4ba   : > { %4387 = vmatpush3.msk.msra.mxu1 %vm1966_vm15, %v5226_v41  ;;  %4416 = vmatprep.subr.msk.mxu0 %vm2200_vm4, %v5226_v41  ;;  %vm2212_vm15 = vcmp.eq.s32.totalorder %v5785_v55, 7  ;;  %vm2181_vm4 = vcmp.eq.s32.totalorder %v5922_v46, 7 }
 0x4bb   : > { %4388 = vmatprep.subr.msk.mxu1 %vm1981_vm5, %v5226_v41  ;;  %4417 = vmatpush3.msk.msra.mxu0 %vm2184_vm6, %v5226_v41  ;;  %vm2196_vm5 = vcmp.eq.s32.totalorder %v5926_v48, 7  ;;  %vm2211_vm6 = vcmp.eq.s32.totalorder %v5929_v49, 7 }
 0x4bc   : > { %4389 = vmatpush3.msk.msra.mxu1 %vm1965_vm7, %v5226_v41  ;;  %4418 = vmatprep.subr.msk.mxu0 %vm2199_vm8, %v5226_v41  ;;  %vm2180_vm7 = vcmp.eq.s32.totalorder %v5935_v51, 7  ;;  %vm2195_vm8 = vcmp.eq.s32.totalorder %v5942_v53, 7 }
 0x4bd   : > { %4390 = vmatprep.subr.msk.mxu1 %vm1980_vm9, %v5226_v41  ;;  %4419 = vmatpush3.msk.msra.mxu0 %vm2183_vm10, %v5226_v41  ;;  %vm2210_vm9 = vcmp.eq.s32.totalorder %v5945_v56, 7  ;;  %vm2179_vm10 = vcmp.eq.s32.totalorder %v5951_v58, 7 }
 0x4be   : > { %4391 = vmatpush3.msk.msra.mxu1 %vm1964_vm11, %v5226_v41  ;;  %4420 = vmatprep.subr.msk.mxu0 %vm2198_vm12, %v5226_v41  ;;  %vm2194_vm11 = vcmp.eq.s32.totalorder %v5965_v4, 7  ;;  %vm2209_vm12 = vcmp.eq.s32.totalorder %v5968_v6, 7 }
 0x4bf   : > { %2101 = vmatmul.mubr.f32.vlgmr.msra.gmra.mxu1 %v6009_v25  ;;  %4421 = vmatpush3.msk.msra.mxu0 %vm2182_vm13, %v5226_v41  ;;  %vm2178_vm13 = vcmp.eq.s32.totalorder %v5973_v8, 7 }
 0x4c0   : > { %4745 = vmatprep.subr.mxu1 %v5221_v0  ;;  %4422 = vmatprep.subr.msk.mxu0 %vm2197_vm14, %v5226_v41  ;;  %vm2421_vm14 = vcmp.eq.s32.totalorder %v5770_v40, 8 }
 0x4c1   : > { %4746 = vmatpush3.msk.msra.mxu1 %vm2212_vm15, %v5226_v41  ;;  %4423 = vmatpush3.msk.msra.mxu0 %vm2181_vm4, %v5226_v41  ;;  %vm2193_vm15 = vcmp.eq.s32.totalorder %v5976_v10, 7  ;;  %vm2405_vm4 = vcmp.eq.s32.totalorder %v5782_v54, 8 }
 0x4c2   : > { %4747 = vmatprep.subr.mxu1 %v5221_v0  ;;  %4424 = vmatprep.subr.msk.mxu0 %vm2196_vm5, %v5226_v41  ;;  %vm2177_vm5 = vcmp.eq.s32.totalorder %v5987_v12, 7 }
 0x4c3   : > { %4748 = vmatpush3.msk.msra.mxu1 %vm2211_vm6, %v5226_v41  ;;  %4425 = vmatpush3.msk.msra.mxu0 %vm2180_vm7, %v5226_v41  ;;  %vm2420_vm6 = vcmp.eq.s32.totalorder %v5788_v57, 8  ;;  %vm2404_vm7 = vcmp.eq.s32.totalorder %v5792_v59, 8 }
 0x4c4   : > { %4749 = vmatprep.subr.mxu1 %v5221_v0  ;;  %4426 = vmatprep.subr.msk.mxu0 %vm2195_vm8, %v5226_v41  ;;  %vm2419_vm8 = vcmp.eq.s32.totalorder %v5796_v62, 8 }
 0x4c5   : > { %4750 = vmatpush3.msk.msra.mxu1 %vm2210_vm9, %v5226_v41  ;;  %4427 = vmatpush3.msk.msra.mxu0 %vm2179_vm10, %v5226_v41  ;;  %vm2425_vm9 = vcmp.eq.s32.totalorder %v5785_v55, 8  ;;  %vm2403_vm10 = vcmp.eq.s32.totalorder %v5799_v63, 8 }
 0x4c6   : > { %4751 = vmatprep.subr.mxu1 %v5221_v0  ;;  %4428 = vmatprep.subr.msk.mxu0 %vm2194_vm11, %v5226_v41  ;;  %vm2418_vm11 = vcmp.eq.s32.totalorder %v5807_v5, 8 }
 0x4c7   : > { %4752 = vmatpush3.msk.msra.mxu1 %vm2209_vm12, %v5226_v41  ;;  %4753 = vmatprep.mubr.msk.f32.mxu1 %vm5222_vm0, %v5221_v0  ;;  %vm2424_vm12 = vcmp.eq.s32.totalorder %v5929_v49, 8 }
 0x4c8   : > { %4429 = vmatpush3.msk.msra.mxu0 %vm2178_vm13, %v5226_v41  ;;  %4754 = vmatmul.mubr.msk.f32.vlgmr.msra.gmra.mxu1 %vm640_vm2, %v5998_v35  ;;  %vm2402_vm13 = vcmp.eq.s32.totalorder %v5814_v7, 8 }
 0x4c9   : > { %4440 = vmatprep.subr.msk.mxu1 %vm2421_vm14, %v5226_v41  ;;  %4430 = vmatprep.subr.msk.mxu0 %vm2193_vm15, %v5226_v41  ;;  %vm2417_vm14 = vcmp.eq.s32.totalorder %v5820_v9, 8  ;;  %vm2423_vm15 = vcmp.eq.s32.totalorder %v5945_v56, 8 }
 0x4ca   : > { %4441 = vmatpush3.msk.msra.mxu1 %vm2405_vm4, %v5226_v41  ;;  %2526 = vmatprep.mubr.f32.mxu1 %v6002_v44  ;;  %vm2401_vm4 = vcmp.eq.s32.totalorder %v5827_v11, 8 }
 0x4cb   : > { %4431 = vmatpush3.msk.msra.mxu0 %vm2177_vm5, %v5226_v41  ;;  %4442 = vmatprep.subr.msk.mxu1 %vm2420_vm6, %v5226_v41  ;;  %vm2416_vm5 = vcmp.eq.s32.totalorder %v5834_v13, 8  ;;  %vm2422_vm6 = vcmp.eq.s32.totalorder %v5968_v6, 8 }
 0x4cc   : > { %2314 = vmatmul.mubr.f32.vlgmr.msra.gmra.mxu0 %v6009_v25  ;;  %4443 = vmatpush3.msk.msra.mxu1 %vm2404_vm7, %v5226_v41  ;;  %vm2400_vm7 = vcmp.eq.s32.totalorder %v5842_v15, 8 }
 0x4cd   : > { %4756 = vmatprep.subr.mxu0 %v5221_v0  ;;  %4444 = vmatprep.subr.msk.mxu1 %vm2419_vm8, %v5226_v41  ;;  %vm2634_vm8 = vcmp.eq.s32.totalorder %v5770_v40, 12 }
 0x4ce   : > { %4757 = vmatpush3.msk.msra.mxu0 %vm2425_vm9, %v5226_v41  ;;  %4445 = vmatpush3.msk.msra.mxu1 %vm2403_vm10, %v5226_v41  ;;  %vm2415_vm9 = vcmp.eq.s32.totalorder %v5848_v17, 8  ;;  %vm2618_vm10 = vcmp.eq.s32.totalorder %v5782_v54, 12 }
 0x4cf   : > { %4758 = vmatprep.subr.mxu0 %v5221_v0  ;;  %4446 = vmatprep.subr.msk.mxu1 %vm2418_vm11, %v5226_v41  ;;  %vm2399_vm11 = vcmp.eq.s32.totalorder %v5854_v19, 8 }
 0x4d0   : > { %4759 = vmatpush3.msk.msra.mxu0 %vm2424_vm12, %v5226_v41  ;;  %4447 = vmatpush3.msk.msra.mxu1 %vm2402_vm13, %v5226_v41  ;;  %vm2633_vm12 = vcmp.eq.s32.totalorder %v5788_v57, 12  ;;  %vm2414_vm13 = vcmp.eq.s32.totalorder %v5860_v21, 8 }
 0x4d1   : > { %4760 = vmatprep.subr.mxu0 %v5221_v0  ;;  %4448 = vmatprep.subr.msk.mxu1 %vm2417_vm14, %v5226_v41  ;;  %vm2617_vm14 = vcmp.eq.s32.totalorder %v5792_v59, 12 }
 0x4d2   : > { %4761 = vmatpush3.msk.msra.mxu0 %vm2423_vm15, %v5226_v41  ;;  %4449 = vmatpush3.msk.msra.mxu1 %vm2401_vm4, %v5226_v41  ;;  %vm2398_vm15 = vcmp.eq.s32.totalorder %v5866_v24, 8  ;;  %vm2632_vm4 = vcmp.eq.s32.totalorder %v5796_v62, 12 }
 0x4d3   : > { %4762 = vmatprep.subr.mxu0 %v5221_v0  ;;  %4450 = vmatprep.subr.msk.mxu1 %vm2416_vm5, %v5226_v41  ;;  %vm2413_vm5 = vcmp.eq.s32.totalorder %v5872_v28, 8 }
 0x4d4   : > { %4763 = vmatpush3.msk.msra.mxu0 %vm2422_vm6, %v5226_v41  ;;  %4764 = vmatprep.mubr.msk.f32.mxu0 %vm5222_vm0, %v5221_v0  ;;  %vm2616_vm6 = vcmp.eq.s32.totalorder %v5799_v63, 12 }
 0x4d5   : > { %4451 = vmatpush3.msk.msra.mxu1 %vm2400_vm7, %v5226_v41  ;;  %4765 = vmatmul.mubr.msk.f32.vlgmr.msra.gmra.mxu0 %vm640_vm2, %v5998_v35  ;;  %vm2397_vm7 = vcmp.eq.s32.totalorder %v5878_v32, 8 }
 0x4d6   : > { %4480 = vmatprep.subr.msk.mxu0 %vm2634_vm8, %v5226_v41  ;;  %4452 = vmatprep.subr.msk.mxu1 %vm2415_vm9, %v5226_v41  ;;  %vm2631_vm8 = vcmp.eq.s32.totalorder %v5807_v5, 12  ;;  %vm2412_vm9 = vcmp.eq.s32.totalorder %v5884_v34, 8 }
 0x4d7   : > { %4481 = vmatpush3.msk.msra.mxu0 %vm2618_vm10, %v5226_v41  ;;  %2739 = vmatprep.mubr.f32.mxu0 %v6002_v44  ;;  %vm2615_vm10 = vcmp.eq.s32.totalorder %v5814_v7, 12 }
 0x4d8   : > { %4453 = vmatpush3.msk.msra.mxu1 %vm2399_vm11, %v5226_v41  ;;  %4482 = vmatprep.subr.msk.mxu0 %vm2633_vm12, %v5226_v41  ;;  %vm2396_vm11 = vcmp.eq.s32.totalorder %v5890_v36, 8  ;;  %vm2630_vm12 = vcmp.eq.s32.totalorder %v5820_v9, 12 }
 0x4d9   : > { %4454 = vmatprep.subr.msk.mxu1 %vm2414_vm13, %v5226_v41  ;;  %4483 = vmatpush3.msk.msra.mxu0 %vm2617_vm14, %v5226_v41  ;;  %vm2411_vm13 = vcmp.eq.s32.totalorder %v5895_v39, 8  ;;  %vm2614_vm14 = vcmp.eq.s32.totalorder %v5827_v11, 12 }
 0x4da   : > { %4455 = vmatpush3.msk.msra.mxu1 %vm2398_vm15, %v5226_v41  ;;  %4484 = vmatprep.subr.msk.mxu0 %vm2632_vm4, %v5226_v41  ;;  %vm2395_vm15 = vcmp.eq.s32.totalorder %v5900_v30, 8  ;;  %vm2629_vm4 = vcmp.eq.s32.totalorder %v5834_v13, 12 }
 0x4db   : > { %4456 = vmatprep.subr.msk.mxu1 %vm2413_vm5, %v5226_v41  ;;  %4485 = vmatpush3.msk.msra.mxu0 %vm2616_vm6, %v5226_v41  ;;  %vm2410_vm5 = vcmp.eq.s32.totalorder %v5905_v42, 8  ;;  %vm2613_vm6 = vcmp.eq.s32.totalorder %v5842_v15, 12 }
 0x4dc   : > { %4457 = vmatpush3.msk.msra.mxu1 %vm2397_vm7, %v5226_v41  ;;  %4486 = vmatprep.subr.msk.mxu0 %vm2631_vm8, %v5226_v41  ;;  %vm2394_vm7 = vcmp.eq.s32.totalorder %v5922_v46, 8  ;;  %vm2628_vm8 = vcmp.eq.s32.totalorder %v5848_v17, 12 }
 0x4dd   : > { %4458 = vmatprep.subr.msk.mxu1 %vm2412_vm9, %v5226_v41  ;;  %4487 = vmatpush3.msk.msra.mxu0 %vm2615_vm10, %v5226_v41  ;;  %vm2409_vm9 = vcmp.eq.s32.totalorder %v5926_v48, 8  ;;  %vm2612_vm10 = vcmp.eq.s32.totalorder %v5854_v19, 12 }
 0x4de   : > { %4459 = vmatpush3.msk.msra.mxu1 %vm2396_vm11, %v5226_v41  ;;  %4488 = vmatprep.subr.msk.mxu0 %vm2630_vm12, %v5226_v41  ;;  %vm2393_vm11 = vcmp.eq.s32.totalorder %v5935_v51, 8  ;;  %vm2627_vm12 = vcmp.eq.s32.totalorder %v5860_v21, 12 }
 0x4df   : > { %4460 = vmatprep.subr.msk.mxu1 %vm2411_vm13, %v5226_v41  ;;  %4489 = vmatpush3.msk.msra.mxu0 %vm2614_vm14, %v5226_v41  ;;  %vm2408_vm13 = vcmp.eq.s32.totalorder %v5942_v53, 8  ;;  %vm2611_vm14 = vcmp.eq.s32.totalorder %v5866_v24, 12 }
 0x4e0   : > { %4461 = vmatpush3.msk.msra.mxu1 %vm2395_vm15, %v5226_v41  ;;  %4490 = vmatprep.subr.msk.mxu0 %vm2629_vm4, %v5226_v41  ;;  %vm2392_vm15 = vcmp.eq.s32.totalorder %v5951_v58, 8  ;;  %vm2626_vm4 = vcmp.eq.s32.totalorder %v5872_v28, 12 }
 0x4e1   : > { %4462 = vmatprep.subr.msk.mxu1 %vm2410_vm5, %v5226_v41  ;;  %4491 = vmatpush3.msk.msra.mxu0 %vm2613_vm6, %v5226_v41  ;;  %vm2407_vm5 = vcmp.eq.s32.totalorder %v5965_v4, 8  ;;  %vm2610_vm6 = vcmp.eq.s32.totalorder %v5878_v32, 12 }
 0x4e2   : > { %4463 = vmatpush3.msk.msra.mxu1 %vm2394_vm7, %v5226_v41  ;;  %4492 = vmatprep.subr.msk.mxu0 %vm2628_vm8, %v5226_v41  ;;  %vm2391_vm7 = vcmp.eq.s32.totalorder %v5973_v8, 8  ;;  %vm2625_vm8 = vcmp.eq.s32.totalorder %v5884_v34, 12 }
 0x4e3   : > { %4464 = vmatprep.subr.msk.mxu1 %vm2409_vm9, %v5226_v41  ;;  %4493 = vmatpush3.msk.msra.mxu0 %vm2612_vm10, %v5226_v41  ;;  %vm2406_vm9 = vcmp.eq.s32.totalorder %v5976_v10, 8  ;;  %vm2609_vm10 = vcmp.eq.s32.totalorder %v5890_v36, 12 }
 0x4e4   : > { %4465 = vmatpush3.msk.msra.mxu1 %vm2393_vm11, %v5226_v41  ;;  %4494 = vmatprep.subr.msk.mxu0 %vm2627_vm12, %v5226_v41  ;;  %vm2390_vm11 = vcmp.eq.s32.totalorder %v5987_v12, 8  ;;  %vm2624_vm12 = vcmp.eq.s32.totalorder %v5895_v39, 12 }
 0x4e5   : > { %4466 = vmatprep.subr.msk.mxu1 %vm2408_vm13, %v5226_v41  ;;  %4495 = vmatpush3.msk.msra.mxu0 %vm2611_vm14, %v5226_v41  ;;  %vm2608_vm13 = vcmp.eq.s32.totalorder %v5900_v30, 12  ;;  %vm2623_vm14 = vcmp.eq.s32.totalorder %v5905_v42, 12 }
 0x4e6   : > { %4467 = vmatpush3.msk.msra.mxu1 %vm2392_vm15, %v5226_v41  ;;  %4496 = vmatprep.subr.msk.mxu0 %vm2626_vm4, %v5226_v41  ;;  %vm2638_vm15 = vcmp.eq.s32.totalorder %v5785_v55, 12  ;;  %vm2607_vm4 = vcmp.eq.s32.totalorder %v5922_v46, 12 }
 0x4e7   : > { %4468 = vmatprep.subr.msk.mxu1 %vm2407_vm5, %v5226_v41  ;;  %4497 = vmatpush3.msk.msra.mxu0 %vm2610_vm6, %v5226_v41  ;;  %vm2622_vm5 = vcmp.eq.s32.totalorder %v5926_v48, 12  ;;  %vm2637_vm6 = vcmp.eq.s32.totalorder %v5929_v49, 12 }
 0x4e8   : > { %4469 = vmatpush3.msk.msra.mxu1 %vm2391_vm7, %v5226_v41  ;;  %4498 = vmatprep.subr.msk.mxu0 %vm2625_vm8, %v5226_v41  ;;  %vm2606_vm7 = vcmp.eq.s32.totalorder %v5935_v51, 12  ;;  %vm2621_vm8 = vcmp.eq.s32.totalorder %v5942_v53, 12 }
 0x4e9   : > { %4470 = vmatprep.subr.msk.mxu1 %vm2406_vm9, %v5226_v41  ;;  %4499 = vmatpush3.msk.msra.mxu0 %vm2609_vm10, %v5226_v41  ;;  %vm2636_vm9 = vcmp.eq.s32.totalorder %v5945_v56, 12  ;;  %vm2605_vm10 = vcmp.eq.s32.totalorder %v5951_v58, 12 }
 0x4ea   : > { %4471 = vmatpush3.msk.msra.mxu1 %vm2390_vm11, %v5226_v41  ;;  %4500 = vmatprep.subr.msk.mxu0 %vm2624_vm12, %v5226_v41  ;;  %vm2620_vm11 = vcmp.eq.s32.totalorder %v5965_v4, 12  ;;  %vm2635_vm12 = vcmp.eq.s32.totalorder %v5968_v6, 12 }
 0x4eb   : > { %2527 = vmatmul.mubr.f32.vlgmr.msra.gmra.mxu1 %v6009_v25  ;;  %4501 = vmatpush3.msk.msra.mxu0 %vm2608_vm13, %v5226_v41  ;;  %vm2604_vm13 = vcmp.eq.s32.totalorder %v5973_v8, 12 }
 0x4ec   : > { %4767 = vmatprep.subr.mxu1 %v5221_v0  ;;  %4502 = vmatprep.subr.msk.mxu0 %vm2623_vm14, %v5226_v41  ;;  %vm2847_vm14 = vcmp.eq.s32.totalorder %v5770_v40, 13 }
 0x4ed   : > { %4768 = vmatpush3.msk.msra.mxu1 %vm2638_vm15, %v5226_v41  ;;  %4503 = vmatpush3.msk.msra.mxu0 %vm2607_vm4, %v5226_v41  ;;  %vm2619_vm15 = vcmp.eq.s32.totalorder %v5976_v10, 12  ;;  %vm2831_vm4 = vcmp.eq.s32.totalorder %v5782_v54, 13 }
 0x4ee   : > { %4769 = vmatprep.subr.mxu1 %v5221_v0  ;;  %4504 = vmatprep.subr.msk.mxu0 %vm2622_vm5, %v5226_v41  ;;  %vm2603_vm5 = vcmp.eq.s32.totalorder %v5987_v12, 12 }
 0x4ef   : > { %4770 = vmatpush3.msk.msra.mxu1 %vm2637_vm6, %v5226_v41  ;;  %4505 = vmatpush3.msk.msra.mxu0 %vm2606_vm7, %v5226_v41  ;;  %vm2846_vm6 = vcmp.eq.s32.totalorder %v5788_v57, 13  ;;  %vm2830_vm7 = vcmp.eq.s32.totalorder %v5792_v59, 13 }
 0x4f0   : > { %4771 = vmatprep.subr.mxu1 %v5221_v0  ;;  %4506 = vmatprep.subr.msk.mxu0 %vm2621_vm8, %v5226_v41  ;;  %vm2845_vm8 = vcmp.eq.s32.totalorder %v5796_v62, 13 }
 0x4f1   : > { %4772 = vmatpush3.msk.msra.mxu1 %vm2636_vm9, %v5226_v41  ;;  %4507 = vmatpush3.msk.msra.mxu0 %vm2605_vm10, %v5226_v41  ;;  %vm2851_vm9 = vcmp.eq.s32.totalorder %v5785_v55, 13  ;;  %vm2829_vm10 = vcmp.eq.s32.totalorder %v5799_v63, 13 }
 0x4f2   : > { %4773 = vmatprep.subr.mxu1 %v5221_v0  ;;  %4508 = vmatprep.subr.msk.mxu0 %vm2620_vm11, %v5226_v41  ;;  %vm2844_vm11 = vcmp.eq.s32.totalorder %v5807_v5, 13 }
 0x4f3   : > { %4774 = vmatpush3.msk.msra.mxu1 %vm2635_vm12, %v5226_v41  ;;  %4775 = vmatprep.mubr.msk.f32.mxu1 %vm5222_vm0, %v5221_v0  ;;  %vm2850_vm12 = vcmp.eq.s32.totalorder %v5929_v49, 13 }
 0x4f4   : > { %4509 = vmatpush3.msk.msra.mxu0 %vm2604_vm13, %v5226_v41  ;;  %4776 = vmatmul.mubr.msk.f32.vlgmr.msra.gmra.mxu1 %vm640_vm2, %v5998_v35  ;;  %vm2828_vm13 = vcmp.eq.s32.totalorder %v5814_v7, 13 }
 0x4f5   : > { %4520 = vmatprep.subr.msk.mxu1 %vm2847_vm14, %v5226_v41  ;;  %4510 = vmatprep.subr.msk.mxu0 %vm2619_vm15, %v5226_v41  ;;  %vm2843_vm14 = vcmp.eq.s32.totalorder %v5820_v9, 13  ;;  %vm2849_vm15 = vcmp.eq.s32.totalorder %v5945_v56, 13 }
 0x4f6   : > { %4521 = vmatpush3.msk.msra.mxu1 %vm2831_vm4, %v5226_v41  ;;  %2952 = vmatprep.mubr.f32.mxu1 %v6002_v44  ;;  %vm2827_vm4 = vcmp.eq.s32.totalorder %v5827_v11, 13 }
 0x4f7   : > { %4511 = vmatpush3.msk.msra.mxu0 %vm2603_vm5, %v5226_v41  ;;  %4522 = vmatprep.subr.msk.mxu1 %vm2846_vm6, %v5226_v41  ;;  %vm2842_vm5 = vcmp.eq.s32.totalorder %v5834_v13, 13  ;;  %vm2848_vm6 = vcmp.eq.s32.totalorder %v5968_v6, 13 }
 0x4f8   : > { %2740 = vmatmul.mubr.f32.vlgmr.msra.gmra.mxu0 %v6009_v25  ;;  %4523 = vmatpush3.msk.msra.mxu1 %vm2830_vm7, %v5226_v41  ;;  %vm2826_vm7 = vcmp.eq.s32.totalorder %v5842_v15, 13 }
 0x4f9   : > { %4778 = vmatprep.subr.mxu0 %v5221_v0  ;;  %4524 = vmatprep.subr.msk.mxu1 %vm2845_vm8, %v5226_v41  ;;  %vm3060_vm8 = vcmp.eq.s32.totalorder %v5770_v40, 14 }
 0x4fa   : > { %4779 = vmatpush3.msk.msra.mxu0 %vm2851_vm9, %v5226_v41  ;;  %4525 = vmatpush3.msk.msra.mxu1 %vm2829_vm10, %v5226_v41  ;;  %vm2841_vm9 = vcmp.eq.s32.totalorder %v5848_v17, 13  ;;  %vm3044_vm10 = vcmp.eq.s32.totalorder %v5782_v54, 14 }
 0x4fb   : > { %4780 = vmatprep.subr.mxu0 %v5221_v0  ;;  %4526 = vmatprep.subr.msk.mxu1 %vm2844_vm11, %v5226_v41  ;;  %vm2825_vm11 = vcmp.eq.s32.totalorder %v5854_v19, 13 }
 0x4fc   : > { %4781 = vmatpush3.msk.msra.mxu0 %vm2850_vm12, %v5226_v41  ;;  %4527 = vmatpush3.msk.msra.mxu1 %vm2828_vm13, %v5226_v41  ;;  %vm3059_vm12 = vcmp.eq.s32.totalorder %v5788_v57, 14  ;;  %vm2840_vm13 = vcmp.eq.s32.totalorder %v5860_v21, 13 }
 0x4fd   : > { %4782 = vmatprep.subr.mxu0 %v5221_v0  ;;  %4528 = vmatprep.subr.msk.mxu1 %vm2843_vm14, %v5226_v41  ;;  %vm3043_vm14 = vcmp.eq.s32.totalorder %v5792_v59, 14 }
 0x4fe   : > { %4783 = vmatpush3.msk.msra.mxu0 %vm2849_vm15, %v5226_v41  ;;  %4529 = vmatpush3.msk.msra.mxu1 %vm2827_vm4, %v5226_v41  ;;  %vm2824_vm15 = vcmp.eq.s32.totalorder %v5866_v24, 13  ;;  %vm3058_vm4 = vcmp.eq.s32.totalorder %v5796_v62, 14 }
 0x4ff   : > { %4784 = vmatprep.subr.mxu0 %v5221_v0  ;;  %4530 = vmatprep.subr.msk.mxu1 %vm2842_vm5, %v5226_v41  ;;  %vm2839_vm5 = vcmp.eq.s32.totalorder %v5872_v28, 13 }
 0x500   : > { %4785 = vmatpush3.msk.msra.mxu0 %vm2848_vm6, %v5226_v41  ;;  %4786 = vmatprep.mubr.msk.f32.mxu0 %vm5222_vm0, %v5221_v0  ;;  %vm3042_vm6 = vcmp.eq.s32.totalorder %v5799_v63, 14 }
 0x501   : > { %4531 = vmatpush3.msk.msra.mxu1 %vm2826_vm7, %v5226_v41  ;;  %4787 = vmatmul.mubr.msk.f32.vlgmr.msra.gmra.mxu0 %vm640_vm2, %v5998_v35  ;;  %vm2823_vm7 = vcmp.eq.s32.totalorder %v5878_v32, 13 }
 0x502   : > { %4560 = vmatprep.subr.msk.mxu0 %vm3060_vm8, %v5226_v41  ;;  %4532 = vmatprep.subr.msk.mxu1 %vm2841_vm9, %v5226_v41  ;;  %vm3057_vm8 = vcmp.eq.s32.totalorder %v5807_v5, 14  ;;  %vm2838_vm9 = vcmp.eq.s32.totalorder %v5884_v34, 13 }
 0x503   : > { %4561 = vmatpush3.msk.msra.mxu0 %vm3044_vm10, %v5226_v41  ;;  %3165 = vmatprep.mubr.f32.mxu0 %v6002_v44  ;;  %vm3041_vm10 = vcmp.eq.s32.totalorder %v5814_v7, 14  ;;  %v3340_v44 = vld [vmem:[%s6824_s7 + $0x50] sm:$0xff] }
 0x504   : > { %4533 = vmatpush3.msk.msra.mxu1 %vm2825_vm11, %v5226_v41  ;;  %4562 = vmatprep.subr.msk.mxu0 %vm3059_vm12, %v5226_v41  ;;  %vm2822_vm11 = vcmp.eq.s32.totalorder %v5890_v36, 13  ;;  %vm3056_vm12 = vcmp.eq.s32.totalorder %v5820_v9, 14 }
 0x505   : > { %4534 = vmatprep.subr.msk.mxu1 %vm2840_vm13, %v5226_v41  ;;  %4563 = vmatpush3.msk.msra.mxu0 %vm3043_vm14, %v5226_v41  ;;  %vm2837_vm13 = vcmp.eq.s32.totalorder %v5895_v39, 13  ;;  %vm3040_vm14 = vcmp.eq.s32.totalorder %v5827_v11, 14 }
 0x506   : > { %4535 = vmatpush3.msk.msra.mxu1 %vm2824_vm15, %v5226_v41  ;;  %4564 = vmatprep.subr.msk.mxu0 %vm3058_vm4, %v5226_v41  ;;  %vm2821_vm15 = vcmp.eq.s32.totalorder %v5900_v30, 13  ;;  %vm3055_vm4 = vcmp.eq.s32.totalorder %v5834_v13, 14 }
 0x507   : > { %4536 = vmatprep.subr.msk.mxu1 %vm2839_vm5, %v5226_v41  ;;  %4565 = vmatpush3.msk.msra.mxu0 %vm3042_vm6, %v5226_v41  ;;  %vm2836_vm5 = vcmp.eq.s32.totalorder %v5905_v42, 13  ;;  %vm3039_vm6 = vcmp.eq.s32.totalorder %v5842_v15, 14 }
 0x508   : > { %4537 = vmatpush3.msk.msra.mxu1 %vm2823_vm7, %v5226_v41  ;;  %4566 = vmatprep.subr.msk.mxu0 %vm3057_vm8, %v5226_v41  ;;  %vm2820_vm7 = vcmp.eq.s32.totalorder %v5922_v46, 13  ;;  %vm3054_vm8 = vcmp.eq.s32.totalorder %v5848_v17, 14 }
 0x509   : > { %4538 = vmatprep.subr.msk.mxu1 %vm2838_vm9, %v5226_v41  ;;  %4567 = vmatpush3.msk.msra.mxu0 %vm3041_vm10, %v5226_v41  ;;  %vm2835_vm9 = vcmp.eq.s32.totalorder %v5926_v48, 13  ;;  %vm3038_vm10 = vcmp.eq.s32.totalorder %v5854_v19, 14 }
 0x50a   : > { %4539 = vmatpush3.msk.msra.mxu1 %vm2822_vm11, %v5226_v41  ;;  %4568 = vmatprep.subr.msk.mxu0 %vm3056_vm12, %v5226_v41  ;;  %vm2819_vm11 = vcmp.eq.s32.totalorder %v5935_v51, 13  ;;  %vm3053_vm12 = vcmp.eq.s32.totalorder %v5860_v21, 14 }
 0x50b   : > { %4540 = vmatprep.subr.msk.mxu1 %vm2837_vm13, %v5226_v41  ;;  %4569 = vmatpush3.msk.msra.mxu0 %vm3040_vm14, %v5226_v41  ;;  %vm2834_vm13 = vcmp.eq.s32.totalorder %v5942_v53, 13  ;;  %vm3037_vm14 = vcmp.eq.s32.totalorder %v5866_v24, 14 }
 0x50c   : > { %4541 = vmatpush3.msk.msra.mxu1 %vm2821_vm15, %v5226_v41  ;;  %4570 = vmatprep.subr.msk.mxu0 %vm3055_vm4, %v5226_v41  ;;  %vm2818_vm15 = vcmp.eq.s32.totalorder %v5951_v58, 13  ;;  %vm3052_vm4 = vcmp.eq.s32.totalorder %v5872_v28, 14  ;;  %v422_v28 = vld [vmem:[#allocation8] sm:$0x3] }
 0x50d   : > { %4542 = vmatprep.subr.msk.mxu1 %vm2836_vm5, %v5226_v41  ;;  %4571 = vmatpush3.msk.msra.mxu0 %vm3039_vm6, %v5226_v41  ;;  %vm2833_vm5 = vcmp.eq.s32.totalorder %v5965_v4, 13  ;;  %vm3036_vm6 = vcmp.eq.s32.totalorder %v5878_v32, 14 }
 0x50e   : > { %4543 = vmatpush3.msk.msra.mxu1 %vm2820_vm7, %v5226_v41  ;;  %4572 = vmatprep.subr.msk.mxu0 %vm3054_vm8, %v5226_v41  ;;  %vm2817_vm7 = vcmp.eq.s32.totalorder %v5973_v8, 13  ;;  %vm3051_vm8 = vcmp.eq.s32.totalorder %v5884_v34, 14 }
 0x50f   : > { %4544 = vmatprep.subr.msk.mxu1 %vm2835_vm9, %v5226_v41  ;;  %4573 = vmatpush3.msk.msra.mxu0 %vm3038_vm10, %v5226_v41  ;;  %vm2832_vm9 = vcmp.eq.s32.totalorder %v5976_v10, 13  ;;  %vm3035_vm10 = vcmp.eq.s32.totalorder %v5890_v36, 14 }
 0x510   : > { %4545 = vmatpush3.msk.msra.mxu1 %vm2819_vm11, %v5226_v41  ;;  %4574 = vmatprep.subr.msk.mxu0 %vm3053_vm12, %v5226_v41  ;;  %vm2816_vm11 = vcmp.eq.s32.totalorder %v5987_v12, 13  ;;  %vm3050_vm12 = vcmp.eq.s32.totalorder %v5895_v39, 14 }
 0x511   : > { %4546 = vmatprep.subr.msk.mxu1 %vm2834_vm13, %v5226_v41  ;;  %4575 = vmatpush3.msk.msra.mxu0 %vm3037_vm14, %v5226_v41  ;;  %vm3034_vm13 = vcmp.eq.s32.totalorder %v5900_v30, 14  ;;  %vm3049_vm14 = vcmp.eq.s32.totalorder %v5905_v42, 14 }
 0x512   : > { %4547 = vmatpush3.msk.msra.mxu1 %vm2818_vm15, %v5226_v41  ;;  %4576 = vmatprep.subr.msk.mxu0 %vm3052_vm4, %v5226_v41  ;;  %vm3064_vm15 = vcmp.eq.s32.totalorder %v5785_v55, 14  ;;  %vm3033_vm4 = vcmp.eq.s32.totalorder %v5922_v46, 14 }
 0x513   : > { %4548 = vmatprep.subr.msk.mxu1 %vm2833_vm5, %v5226_v41  ;;  %4577 = vmatpush3.msk.msra.mxu0 %vm3036_vm6, %v5226_v41  ;;  %vm3048_vm5 = vcmp.eq.s32.totalorder %v5926_v48, 14  ;;  %vm3063_vm6 = vcmp.eq.s32.totalorder %v5929_v49, 14 }
 0x514   : > { %4549 = vmatpush3.msk.msra.mxu1 %vm2817_vm7, %v5226_v41  ;;  %4578 = vmatprep.subr.msk.mxu0 %vm3051_vm8, %v5226_v41  ;;  %vm3032_vm7 = vcmp.eq.s32.totalorder %v5935_v51, 14  ;;  %vm3047_vm8 = vcmp.eq.s32.totalorder %v5942_v53, 14 }
 0x515   : > { %4550 = vmatprep.subr.msk.mxu1 %vm2832_vm9, %v5226_v41  ;;  %4579 = vmatpush3.msk.msra.mxu0 %vm3035_vm10, %v5226_v41  ;;  %vm3062_vm9 = vcmp.eq.s32.totalorder %v5945_v56, 14  ;;  %vm3031_vm10 = vcmp.eq.s32.totalorder %v5951_v58, 14 }
 0x516   : > { %4551 = vmatpush3.msk.msra.mxu1 %vm2816_vm11, %v5226_v41  ;;  %4580 = vmatprep.subr.msk.mxu0 %vm3050_vm12, %v5226_v41  ;;  %vm3046_vm11 = vcmp.eq.s32.totalorder %v5965_v4, 14  ;;  %vm3061_vm12 = vcmp.eq.s32.totalorder %v5968_v6, 14 }
 0x517   : > { %2953 = vmatmul.mubr.f32.vlgmr.msra.gmra.mxu1 %v6009_v25  ;;  %4581 = vmatpush3.msk.msra.mxu0 %vm3034_vm13, %v5226_v41  ;;  %vm3030_vm13 = vcmp.eq.s32.totalorder %v5973_v8, 14 }
 0x518   : > { %4789 = vmatprep.subr.mxu1 %v5221_v0  ;;  %4582 = vmatprep.subr.msk.mxu0 %vm3049_vm14, %v5226_v41  ;;  %vm3045_vm14 = vcmp.eq.s32.totalorder %v5976_v10, 14 }
 0x519   : > { %4790 = vmatpush3.msk.msra.mxu1 %vm3064_vm15, %v5226_v41  ;;  %4583 = vmatpush3.msk.msra.mxu0 %vm3033_vm4, %v5226_v41  ;;  %vm3029_vm15 = vcmp.eq.s32.totalorder %v5987_v12, 14 }
 0x51a   : > { %4791 = vmatprep.subr.mxu1 %v5221_v0  ;;  %4584 = vmatprep.subr.msk.mxu0 %vm3048_vm5, %v5226_v41 }
 0x51b   : > { %4792 = vmatpush3.msk.msra.mxu1 %vm3063_vm6, %v5226_v41  ;;  %4585 = vmatpush3.msk.msra.mxu0 %vm3032_vm7, %v5226_v41 }
 0x51c   : > { %4793 = vmatprep.subr.mxu1 %v5221_v0  ;;  %4586 = vmatprep.subr.msk.mxu0 %vm3047_vm8, %v5226_v41 }
 0x51d   : > { %4794 = vmatpush3.msk.msra.mxu1 %vm3062_vm9, %v5226_v41  ;;  %4587 = vmatpush3.msk.msra.mxu0 %vm3031_vm10, %v5226_v41 }
 0x51e   : > { %4795 = vmatprep.subr.mxu1 %v5221_v0  ;;  %4588 = vmatprep.subr.msk.mxu0 %vm3046_vm11, %v5226_v41 }
 0x51f   : > { %4796 = vmatpush3.msk.msra.mxu1 %vm3061_vm12, %v5226_v41  ;;  %4797 = vmatprep.mubr.msk.f32.mxu1 %vm5222_vm0, %v5221_v0 }
 0x520   : > { %4589 = vmatpush3.msk.msra.mxu0 %vm3030_vm13, %v5226_v41  ;;  %4798 = vmatmul.mubr.msk.f32.vlgmr.msra.gmra.mxu1 %vm640_vm2, %v5998_v35  ;;  %v3342_v35 = vld [vmem:[%s6824_s7 + $0x60] sm:$0xff] }
 0x521   : > { %4590 = vmatprep.subr.msk.mxu0 %vm3045_vm14, %v5226_v41  ;;  %4800 = vmatprep.subr.mxu1 %v5221_v0 }
 0x522   : > { %4591 = vmatpush3.msk.msra.mxu0 %vm3029_vm15, %v5226_v41  ;;  %4818 = vmatprep.mubr.msk.f32.mxu1 %vm5222_vm0, %v5221_v0 }
 0x523   : > { %3166 = vmatmul.mubr.f32.vlgmr.msra.gmra.mxu0 %v6009_v25  ;;  %4856 = vmatprep.subr.mxu0 %v5221_v0  ;;  %v3339_v25 = vld [vmem:[%s6824_s7 + $0x48] sm:$0xff] }
 0x524   : > { %4858 = vmatprep.mubr.msk.f32.mxu0 %vm5222_vm0, %v5221_v0  ;;  %3254 = vperm.xlu1 %5001, %v422_v28  }
 0x525   : > { %3646 = vperm.xlu0 %5003, %v422_v28  }
 0x528   : > { %5002 = vset.pattern.permute.xlu1 %v5224_v23 }
 0x529   : > { %3567 = vperm.xlu1 %5002, %v422_v28  }
 0x531   : > { %v1533_v27 = vpop.f32.mrf.mxu1 }
 0x533   : > { %v4711_v31 = vpop.f32.mrf.mxu1 }
 0x534   : > { %v3337_v31 = vld [vmem:[%s6824_s7 + $0x38] sm:$0xff] }
 0x535   : > { %v4272_v40 = vpop.f32.mrf.mxu0 }
 0x537   : > { %v4273_v54 = vpop.f32.mrf.mxu0 }
 0x538   : > { %v4274_v55 = vadd.f32 %v4273_v54, %v4272_v40  ;;  %v3336_v40 = vld [vmem:[%s6824_s7 + $0x30] sm:$0xff]  ;;  %v3335_v54 = vld [vmem:[%s6824_s7 + $0x28] sm:$0xff] }
 0x53a   : > { %v6667_v57 = vadd.f32 %v4274_v55, %v1533_v27  ;;  %v3338_v27 = vld [vmem:[%s6824_s7 + $0x40] sm:$0xff] }
 0x53b   : > { %v3334_v55 = vld [vmem:[%s6824_s7 + $0x20] sm:$0xff] }
 0x53d   : > { %v1746_v59 = vpop.f32.mrf.mxu0 }
 0x53f   : > { %v4722_v62 = vpop.f32.mrf.mxu0 }
 0x540   : > { %v3331_v62 = vld [vmem:[%s6824_s7 + $0x8] sm:$0xff] }
 0x553   : > { %v4312_v41 = vpop.f32.mrf.mxu1 }
 0x555   : > { %v4313_v63 = vpop.f32.mrf.mxu1 }
 0x556   : > { %v4314_v5 = vadd.f32 %v4313_v63, %v4312_v41  ;;  %v3330_v41 = vld [vmem:[%s6824_s7] sm:$0xff] }
 0x557   : > { %v3346_v63 = vld [vmem:[#allocation11] sm:$0xff] }
 0x558   : > { %v1747_v7 = vadd.f32 %v4314_v5, %v1746_v59  ;;  %v3332_v59 = vld [vmem:[%s6824_s7 + $0x10] sm:$0xff]  ;;  %4857 = vmatpush3.msra.mxu0 %v3346_v63 }
 0x559   : > { %4861 = vmatprep.subr.mxu0 %v5221_v0 }
 0x55c   : > { %v1959_v9 = vpop.f32.mrf.mxu1 }
 0x55e   : > { %v4733_v11 = vpop.f32.mrf.mxu1 }
 0x560   : > { %v4352_v13 = vpop.f32.mrf.mxu0 }
 0x562   : > { %v4353_v15 = vpop.f32.mrf.mxu0 }
 0x563   : > { %v4354_v17 = vadd.f32 %v4353_v15, %v4352_v13 }
 0x565   : > { %v1960_v19 = vadd.f32 %v4354_v17, %v1959_v9 }
 0x569   : > { %v2172_v21 = vpop.f32.mrf.mxu0 }
 0x56b   : > { %v4744_v24 = vpop.f32.mrf.mxu0 }
 0x57f   : > { %v4392_v32 = vpop.f32.mrf.mxu1 }
 0x581   : > { %v4393_v34 = vpop.f32.mrf.mxu1 }
 0x582   : > { %v4394_v36 = vadd.f32 %v4393_v34, %v4392_v32 }
 0x584   : > { %v2173_v39 = vadd.f32 %v4394_v36, %v2172_v21 }
 0x588   : > { %v2385_v30 = vpop.f32.mrf.mxu1 }
 0x58a   : > { %v4755_v42 = vpop.f32.mrf.mxu1 }
 0x58c   : > { %v4432_v45 = vpop.f32.mrf.mxu0 }
 0x58e   : > { %v4433_v46 = vpop.f32.mrf.mxu0 }
 0x58f   : > { %v4434_v47 = vadd.f32 %v4433_v46, %v4432_v45 }
 0x591   : > { %v2386_v48 = vadd.f32 %v4434_v47, %v2385_v30 }
 0x595   : > { %v2598_v49 = vpop.f32.mrf.mxu0 }
 0x597   : > { %v4766_v50 = vpop.f32.mrf.mxu0 }
 0x59f   : > { %v3255_v5 = vpop.permute.xlu1 %3254 }
 0x5a4   : > { %v3568_v30 = vpop.permute.xlu1 %3567 }
 0x5ab   : > { %v4472_v1 = vpop.f32.mrf.mxu1 }
 0x5ad   : > { %v4473_v51 = vpop.f32.mrf.mxu1 }
 0x5ae   : > { %v4474_v18 = vadd.f32 %v4473_v51, %v4472_v1 }
 0x5b0   : > { %v2599_v38 = vadd.f32 %v4474_v18, %v2598_v49 }
 0x5b4   : > { %v2811_v52 = vpop.f32.mrf.mxu1 }
 0x5b6   : > { %v4777_v53 = vpop.f32.mrf.mxu1 }
 0x5b8   : > { %v4512_v56 = vpop.f32.mrf.mxu0 }
 0x5ba   : > { %v4513_v58 = vpop.f32.mrf.mxu0 }
 0x5bb   : > { %v4514_v14 = vadd.f32 %v4513_v58, %v4512_v56 }
 0x5bd   : > { %v2812_v37 = vadd.f32 %v4514_v14, %v2811_v52 }
 0x5c1   : > { %v3024_v60 = vpop.f32.mrf.mxu0 }
 0x5c3   : > { %v4788_v23 = vpop.f32.mrf.mxu0 }
 0x5d7   : > { %v4552_v61 = vpop.f32.mrf.mxu1 }
 0x5d9   : > { %v4553_v2 = vpop.f32.mrf.mxu1 }
 0x5da   : > { %v4554_v10 = vadd.f32 %v4553_v2, %v4552_v61 }
 0x5dc   : > { %v3025_v20 = vadd.f32 %v4554_v10, %v3024_v60 }
 0x5e0   : > { %v3237_v3 = vpop.f32.mrf.mxu1 }
 0x5e2   : > { %v4799_v4 = vpop.f32.mrf.mxu1 }
 0x5e3   : > { %v4592_v6 = vpop.f32.mrf.mxu0 }
 0x5e5   : > { %v4593_v8 = vpop.f32.mrf.mxu0 }
 0x5e6   : > { %v4594_v12 = vadd.f32 %v4593_v8, %v4592_v6 }
 0x5e8   : > { %v3238_v16 = vadd.f32 %v4594_v12, %v3237_v3 }
 0x5ea   : > { %4801 = vmatpush3.msra.mxu1 %v3238_v16 }
 0x5eb   : > { %4802 = vmatprep.subr.mxu1 %v5221_v0 }
 0x5ec   : > { %4803 = vmatpush3.msra.mxu1 %v3025_v20 }
 0x5ed   : > { %4804 = vmatprep.subr.mxu1 %v5221_v0 }
 0x5ee   : > { %4805 = vmatpush3.msra.mxu1 %v2812_v37 }
 0x5ef   : > { %4806 = vmatprep.subr.mxu1 %v5221_v0 }
 0x5f0   : > { %4807 = vmatpush3.msra.mxu1 %v2599_v38 }
 0x5f1   : > { %4808 = vmatprep.subr.mxu1 %v5221_v0 }
 0x5f2   : > { %4809 = vmatpush3.msra.mxu1 %v2386_v48 }
 0x5f3   : > { %4810 = vmatprep.subr.mxu1 %v5221_v0 }
 0x5f4   : > { %4811 = vmatpush3.msra.mxu1 %v2173_v39 }
 0x5f5   : > { %4812 = vmatprep.subr.mxu1 %v5221_v0 }
 0x5f6   : > { %4813 = vmatpush3.msra.mxu1 %v1960_v19 }
 0x5f7   : > { %4814 = vmatprep.subr.mxu1 %v5221_v0 }
 0x5f8   : > { %4815 = vmatpush3.msra.mxu1 %v1747_v7 }
 0x5f9   : > { %4816 = vmatprep.subr.mxu1 %v5221_v0 }
 0x5fa   : > { %4817 = vmatpush3.msra.mxu1 %v6667_v57  ;;  %v3333_v57 = vld [vmem:[%s6824_s7 + $0x18] sm:$0xff] }
 0x5fb   : > { %4819 = vmatmul.mubr.msk.f32.vlgmr.msra.gmra.mxu1 %vm456_vm1, %v3242_v22  ;;  %4821 = vmatprep.subr.mxu1 %v5221_v0 }
 0x5fc   : > { %4822 = vmatpush3.msra.mxu1 %v6681_v26  ;;  %4853 = vmatprep.mubr.msk.f32.mxu1 %vm5222_vm0, %v5221_v0 }
 0x5fd   : > { %4823 = vmatprep.subr.mxu1 %v5221_v0 }
 0x5fe   : > { %4824 = vmatpush3.msra.mxu1 %v6689_v29 }
 0x5ff   : > { %4825 = vmatprep.subr.mxu1 %v5221_v0 }
 0x600   : > { %4826 = vmatpush3.msra.mxu1 %v3343_v33 }
 0x601   : > { %4827 = vmatprep.subr.mxu1 %v5221_v0 }
 0x602   : > { %4828 = vmatpush3.msra.mxu1 %v3342_v35 }
 0x603   : > { %4829 = vmatprep.subr.mxu1 %v5221_v0 }
 0x604   : > { %4830 = vmatpush3.msra.mxu1 %v3341_v43 }
 0x605   : > { %4831 = vmatprep.subr.mxu1 %v5221_v0 }
 0x606   : > { %4832 = vmatpush3.msra.mxu1 %v3340_v44 }
 0x607   : > { %4833 = vmatprep.subr.mxu1 %v5221_v0 }
 0x608   : > { %4834 = vmatpush3.msra.mxu1 %v3339_v25 }
 0x609   : > { %4835 = vmatprep.subr.mxu1 %v5221_v0 }
 0x60a   : > { %4836 = vmatpush3.msra.mxu1 %v3338_v27 }
 0x60b   : > { %4837 = vmatprep.subr.mxu1 %v5221_v0 }
 0x60c   : > { %4838 = vmatpush3.msra.mxu1 %v3337_v31 }
 0x60d   : > { %4839 = vmatprep.subr.mxu1 %v5221_v0 }
 0x60e   : > { %4840 = vmatpush3.msra.mxu1 %v3336_v40 }
 0x60f   : > { %4841 = vmatprep.subr.mxu1 %v5221_v0 }
 0x610   : > { %4842 = vmatpush3.msra.mxu1 %v3335_v54 }
 0x611   : > { %4843 = vmatprep.subr.mxu1 %v5221_v0 }
 0x612   : > { %4844 = vmatpush3.msra.mxu1 %v3334_v55 }
 0x613   : > { %4845 = vmatprep.subr.mxu1 %v5221_v0 }
 0x614   : > { %4846 = vmatpush3.msra.mxu1 %v3333_v57 }
 0x615   : > { %4847 = vmatprep.subr.mxu1 %v5221_v0 }
 0x616   : > { %4848 = vmatpush3.msra.mxu1 %v3332_v59 }
 0x617   : > { %4849 = vmatprep.subr.mxu1 %v5221_v0 }
 0x618   : > { %4850 = vmatpush3.msra.mxu1 %v3331_v62 }
 0x619   : > { %4851 = vmatprep.subr.mxu1 %v5221_v0 }
 0x61a   : > { %4852 = vmatpush3.msra.mxu1 %v3330_v41 }
 0x61b   : > { %4896 = vmatprep.subr.mxu1 %v5221_v0 }
 0x6bb   : > { %v3326_v7 = vpop.f32.mrf.mxu1 }
 0x6bc   : > { %v3327_v9 = vadd.f32 %v3326_v7, %v3255_v5 }
 0x6bd   : > { %v4820_v11 = vpop.f32.mrf.mxu1 }
 0x6be   : > { %4854 = vmatmul.mubr.f32.vlgmr.msra.gmra.mxu1 %v3327_v9 }
 0x6bf   : > { %4897 = vmatpush3.msra.mxu1 %v3346_v63  ;;  %4898 = vmatprep.mubr.msk.f32.mxu1 %vm5222_vm0, %v5221_v0 }
 0x77e   : > { %v3413_v13 = vpop.f32.mrf.mxu1 }
 0x77f   : > { %v3417_v15 = vmul.f32 0.0625, %v3413_v13 }
 0x780   : > { %v4855_v17 = vpop.f32.mrf.mxu1 }
 0x781   : > { %4859 = vmatmul.mubr.msk.f32.vlgmr.msra.gmra.mxu0 %vm785_vm3, %v3417_v15 }
 0x782   : > { %4862 = vmatpush3.msra.mxu0 %v6681_v26  ;;  %4893 = vmatprep.mubr.msk.f32.mxu0 %vm5222_vm0, %v5221_v0 }
 0x783   : > { %4863 = vmatprep.subr.mxu0 %v5221_v0 }
 0x784   : > { %4864 = vmatpush3.msra.mxu0 %v6689_v29 }
 0x785   : > { %4865 = vmatprep.subr.mxu0 %v5221_v0 }
 0x786   : > { %4866 = vmatpush3.msra.mxu0 %v3343_v33 }
 0x787   : > { %4867 = vmatprep.subr.mxu0 %v5221_v0 }
 0x788   : > { %4868 = vmatpush3.msra.mxu0 %v3342_v35 }
 0x789   : > { %4869 = vmatprep.subr.mxu0 %v5221_v0 }
 0x78a   : > { %4870 = vmatpush3.msra.mxu0 %v3341_v43 }
 0x78b   : > { %4871 = vmatprep.subr.mxu0 %v5221_v0 }
 0x78c   : > { %4872 = vmatpush3.msra.mxu0 %v3340_v44 }
 0x78d   : > { %4873 = vmatprep.subr.mxu0 %v5221_v0 }
 0x78e   : > { %4874 = vmatpush3.msra.mxu0 %v3339_v25 }
 0x78f   : > { %4875 = vmatprep.subr.mxu0 %v5221_v0 }
 0x790   : > { %4876 = vmatpush3.msra.mxu0 %v3338_v27 }
 0x791   : > { %4877 = vmatprep.subr.mxu0 %v5221_v0 }
 0x792   : > { %4878 = vmatpush3.msra.mxu0 %v3337_v31 }
 0x793   : > { %4879 = vmatprep.subr.mxu0 %v5221_v0 }
 0x794   : > { %4880 = vmatpush3.msra.mxu0 %v3336_v40 }
 0x795   : > { %4881 = vmatprep.subr.mxu0 %v5221_v0 }
 0x796   : > { %4882 = vmatpush3.msra.mxu0 %v3335_v54 }
 0x797   : > { %4883 = vmatprep.subr.mxu0 %v5221_v0 }
 0x798   : > { %4884 = vmatpush3.msra.mxu0 %v3334_v55 }
 0x799   : > { %4885 = vmatprep.subr.mxu0 %v5221_v0 }
 0x79a   : > { %4886 = vmatpush3.msra.mxu0 %v3333_v57 }
 0x79b   : > { %4887 = vmatprep.subr.mxu0 %v5221_v0 }
 0x79c   : > { %4888 = vmatpush3.msra.mxu0 %v3332_v59 }
 0x79d   : > { %4889 = vmatprep.subr.mxu0 %v5221_v0 }
 0x79e   : > { %4890 = vmatpush3.msra.mxu0 %v3331_v62 }
 0x79f   : > { %4891 = vmatprep.subr.mxu0 %v5221_v0  ;;  %v3647_v0 = vpop.permute.xlu0 %3646 }
 0x7a0   : > { %4892 = vmatpush3.msra.mxu0 %v3330_v41 }
 0x841   : > { %v3487_v19 = vpop.f32.mrf.mxu0 }
 0x842   : > { %v3491_v21 = vsub.f32 %v3327_v9, %v3487_v19 }
 0x843   : > { %v4860_v24 = vpop.f32.mrf.mxu0 }
 0x844   : > { %v3492_v28 = vmul.f32 %v3491_v21, %v3491_v21 }
 0x846   : > { %4894 = vmatmul.mubr.f32.vlgmr.msra.gmra.mxu0 %v3492_v28 }
 0x906   : > { %v3559_v32 = vpop.f32.mrf.mxu0 }
 0x907   : > { %v3563_v34 = vmul.f32 0.0625, %v3559_v32 }
 0x908   : > { %v4895_v36 = vpop.f32.mrf.mxu0 }
 0x909   : > { %v3564_v39 = vadd.f32 1e-05, %v3563_v34 }
 0x90b   : > { %5006 = vrsqrt.f32 %v3564_v39 }
 0x918   : > { %v5007_v42 = vpop.eup %5006 }
 0x919   : > { %v3570_v45 = vmul.f32 %v5007_v42, %v3568_v30 }
 0x91b   : > { %4899 = vmatmul.mubr.msk.f32.vlgmr.msra.gmra.mxu1 %vm785_vm3, %v3570_v45 }
 0x9db   : > { %v3640_v46 = vpop.f32.mrf.mxu1 }
 0x9dc   : > { %v3644_v47 = vmul.f32 %v3640_v46, %v3491_v21 }
 0x9dd   : > { %v4900_v48 = vpop.f32.mrf.mxu1 }
 0x9de   : > { %v3649_v49 = vadd.f32 %v3647_v0, %v3644_v47 }
 0x9e0   : > { %v4141_v50 = vmul.f32 -1.442695, %v3649_v49 }
 0x9e2   : > { %5008 = vpow2.f32 %v4141_v50 }
 0x9ef   : > { %v5009_v1 = vpop.eup %5008 }
 0x9f0   : > { %v3653_v51 = vadd.f32 1.0, %v5009_v1 }
 0x9f2   : > { %5010 = vrcp.f32 %v3653_v51 }
 0x9ff   : > { %v5011_v52 = vpop.eup %5010 }
 0xa00   : > { %3656 = vst [vmem:[%s415_s21] sm:$0x3] %v5011_v52 }
 0xa01   : > { %5155 = shalt.err (!%p5152_p0)
}
 0xa02   : > { %s5156_s20 = scalar_lea.hbm %s6782_s25, 32  ;;  %s5160_s21 = scalar_lea.hbm %s6827_s10, 64 }
 0xa03   : > { %p5157_p13 = scmp.ne.s32.totalorder %s6782_s25, %s5156_s20  ;;  %p5161_p3 = scmp.lt.s32.totalorder %s6782_s25, %s6827_s10 }
 0xa04   : > { %p5162_p12 = scmp.lt.s32.totalorder %s5160_s21, %s5156_s20 }
 0xa05   : > { %p5158_p1 = pnand %p5157_p13, %p6845_p5 }
 0xa06   : > { %p5163_p9 = por %p5162_p12, %p5161_p3 }
 0xa07   : > { %p5159_p2 = pneg %p5158_p1 }
 0xa09   : > { %p5164_p4 = pnand %p5163_p9, %p5159_p2 }
 0xa0b   : > { %5167 = shalt.err (!%p5164_p4)
}
 0xa0c   : > { %4922 = dma.vmem_to_hbm [thread:$0]  (%p6845_p5), %s3672_s12, 32, %s6782_s25, %s3658_s30  }
 0xa0d PF: > { %p4954_p6 = scmp.ge.s32.totalorder %s5214_s16, 2  ;;  %s3683_s18 = sand.u32 1, %s5202_s13  }
 0xa0e   : > { %p6846_p10 = scmp.ne.s32.totalorder %s6833_s24, 0  ;;  %s3684_s29 = scalar_lea.sflag [#allocation5], %s3683_s18 }
 0xa10   : > { %p4941_p7 = pnand %p4954_p6, %p6846_p10 }
 0xa12   : > { %p4942_p8 = pneg %p4941_p7 }
 0xa14   : > { %5197 = dma.done.wait (%p4942_p8), %s3684_s29, 32  }
 0xa15   : > { %5199 = vsyncadd (%p4942_p8), %s3684_s29, 4294967264  ;;  %p23_p11 = scmp.ge.s32.totalorder %s5308_s19, 4   ;;  %s6847_s13 = smov %s5206_s14 }
 0xa16   : > { %s6848_s14 = smov %s5210_s15  ;;  %s6849_s15 = smov %s5319_s22 }
 0xa17   : > { %s6850_s16 = smov %s5308_s19  ;;  %25 = sbr.rel (!%p23_p11) target bundleno = 8 (0x8), region = 116 }
 0xa1c   :  { %3689 = vsyncpa [#allocation4], 1 }
 0xa1d   :  { %3691 = vsyncpa [#allocation4 + $0x1], 1 }
 0xa1e   :  { %3692 = vsyncpa [#allocation7], 1 }
 0xa1f   :  { %3693 = vsyncpa [#allocation10], 1 }
 0xa20   :  { %3694 = vsyncpa [#allocation5], 1 }
 0xa21   :  { %3696 = vsyncpa [#allocation5 + $0x1], 1 }

</bundles_post_ra>
